<compile_context>
chip_gen: v7x
topology: tpu7x:2x2x1
jax: 0.10.0
libtpu: 0.0.40
codegen_flags: <defaults>
</compile_context>

<pallas_src>
import jax
import jax.numpy as jnp
from jax.experimental import pallas as pl
from jax.experimental.pallas import tpu as pltpu

OPT = dict(
    dim_v=32, dim_q=32, dim_hv=32, dim_hq=32, dim_mm=16, R=3,
    dropout_v=0.0, dropout_q=0.0, dropout_hv=0.0, dropout_hq=0.0,
    activation_v="tanh", activation_q="tanh",
)

PACK = 8  # logical rows packed per physical (lane-dense) row


def _round_up(x, m):
    return ((x + m - 1) // m) * m


# ---------------------------------------------------------------------------
# Kernel: one grid step processes tg packed rows (= tg*PACK logical rows).
#   xv8  : (tg, PACK*dv)  f32       packed visual rows
#   xq8  : (tg, PACK*dq)  f32       packed question rows
#   w1   : (2, PACK*dv, PACK*dhv)   block-diag [Wv x8], [Wq x8]   (bf16 or f32)
#   b1   : (2, 1, PACK*dhv)  f32    tiled biases
#   w2   : (2, PACK*dhv, PACK*R*dmm) block-diag [Whv_cat x8], [Whq_cat x8]
#   b2   : (2, 1, PACK*R*dmm) f32
#   s    : (PACK*R*dmm, PACK*dmm)   block-diag 0/1 rank-sum matrix
#   out  : (tg, PACK*dmm)  f32      lane-dense (128-lane) packed output
# ---------------------------------------------------------------------------
def mutan_kernel(xv_ref, xq_ref, w1_ref, b1_ref, w2_ref, b2_ref, s_ref, out_ref):
    cdt = w1_ref.dtype  # matmul operand dtype (bf16 by default; f32 for checks)
    hv = jnp.tanh(
        jnp.dot(xv_ref[...].astype(cdt), w1_ref[0],
                preferred_element_type=jnp.float32) + b1_ref[0])
    hq = jnp.tanh(
        jnp.dot(xq_ref[...].astype(cdt), w1_ref[1],
                preferred_element_type=jnp.float32) + b1_ref[1])
    pv = jnp.dot(hv.astype(cdt), w2_ref[0],
                 preferred_element_type=jnp.float32) + b2_ref[0]
    pq = jnp.dot(hq.astype(cdt), w2_ref[1],
                 preferred_element_type=jnp.float32) + b2_ref[1]
    prod = pv * pq  # f32 elementwise Tucker product on the VPU
    # rank-sum + lane packing as one more matmul (0/1 matrix, exact in bf16)
    out_ref[...] = jnp.dot(prod.astype(s_ref.dtype), s_ref[...],
                           preferred_element_type=jnp.float32).astype(out_ref.dtype)


def init_params(key, opt):
    ks = jax.random.split(key, 8)
    dv, dq = opt["dim_v"], opt["dim_q"]
    dhv, dhq, dmm, R = opt["dim_hv"], opt["dim_hq"], opt["dim_mm"], opt["R"]
    s = 0.05
    return dict(
        wv=s * jax.random.normal(ks[0], (dv, dhv), jnp.float32),
        bv=s * jax.random.normal(ks[1], (1, dhv), jnp.float32),
        wq=s * jax.random.normal(ks[2], (dq, dhq), jnp.float32),
        bq=s * jax.random.normal(ks[3], (1, dhq), jnp.float32),
        whv=s * jax.random.normal(ks[4], (R, dhv, dmm), jnp.float32),
        bhv=s * jax.random.normal(ks[5], (R, 1, dmm), jnp.float32),
        whq=s * jax.random.normal(ks[6], (R, dhq, dmm), jnp.float32),
        bhq=s * jax.random.normal(ks[7], (R, 1, dmm), jnp.float32),
    )


def prepare_fused_params(params, opt, pack=PACK, dtype=jnp.bfloat16):
    """One-time weight prep: fuse the R rank projections, fold into 8x
    block-diagonal slabs so the kernel sees full-width (K=256) matmuls and a
    128-lane-dense output.  Weight slabs stored in `dtype` (bf16 by default)
    for single-pass MXU matmuls; biases kept f32 (added to f32 accumulators).
    Assumes dim_v==dim_q and dim_hv==dim_hq (true for OPT)."""
    wv, bv = params["wv"], params["bv"]
    wq, bq = params["wq"], params["bq"]
    whv, bhv = params["whv"], params["bhv"]      # (R, dhv, dmm), (R, 1, dmm)
    whq, bhq = params["whq"], params["bhq"]
    R, dhv, dmm = whv.shape
    dhq = whq.shape[1]
    assert wv.shape[0] == wq.shape[0] and dhv == dhq, (
        "packed-slab layout assumes dim_v==dim_q and dim_hv==dim_hq; "
        "split the modality stacks otherwise")

    # concat the R rank projections along the output dim: column index r*dmm+c
    whv_cat = jnp.transpose(whv, (1, 0, 2)).reshape(dhv, R * dmm)
    whq_cat = jnp.transpose(whq, (1, 0, 2)).reshape(dhq, R * dmm)
    bhv_cat = jnp.transpose(bhv, (1, 0, 2)).reshape(1, R * dmm)
    bhq_cat = jnp.transpose(bhq, (1, 0, 2)).reshape(1, R * dmm)

    eye_p = jnp.eye(pack, dtype=jnp.float32)
    # rank-sum selection matrix: (R*dmm, dmm), S[r*dmm+c, c'] = [c == c']
    s_mat = jnp.tile(jnp.eye(dmm, dtype=jnp.float32), (R, 1))

    return dict(
        w1=jnp.stack([jnp.kron(eye_p, wv), jnp.kron(eye_p, wq)]).astype(dtype),
        b1=jnp.stack([jnp.tile(bv, (1, pack)), jnp.tile(bq, (1, pack))]),
        w2=jnp.stack([jnp.kron(eye_p, whv_cat),
                      jnp.kron(eye_p, whq_cat)]).astype(dtype),
        b2=jnp.stack([jnp.tile(bhv_cat, (1, pack)),
                      jnp.tile(bhq_cat, (1, pack))]),
        s=jnp.kron(eye_p, s_mat).astype(dtype),
    )


def _full_spec(arr):
    nd = arr.ndim
    return pl.BlockSpec(arr.shape, lambda i, _nd=nd: (0,) * _nd)


def mutan_fusion_2d(input_v, input_q, fused, opt, tm=4096, vmem_limit_bytes=None):
    """tm = logical rows (of the B*W x dim view) per grid step.
    Default tm=4096 (tg=512 packed rows) fits v5e/v6e/v7x default scoped VMEM;
    pass tm=8192 + vmem_limit_bytes=64<<20 on v6e if desired."""
    B, W, dv = input_v.shape
    dq = input_q.shape[-1]
    dmm, dhv, dhq, R = opt["dim_mm"], opt["dim_hv"], opt["dim_hq"], opt["R"]
    N = B * W

    # Pad only to a multiple of PACK (<=7 rows, and only when needed) so the
    # packed reshape is valid; NO padding to the tile size (edge blocks are
    # handled by the cdiv grid with clamped/masked DMA).
    Npad = _round_up(N, PACK)
    xv = input_v.reshape(N, dv)
    xq = input_q.reshape(N, dq)
    if Npad != N:
        xv = jnp.pad(xv, ((0, Npad - N), (0, 0)))
        xq = jnp.pad(xq, ((0, Npad - N), (0, 0)))

    G = Npad // PACK                    # packed (lane-dense) rows
    xv8 = xv.reshape(G, PACK * dv)      # contiguous reshape: free
    xq8 = xq.reshape(G, PACK * dq)

    # Packed-rows-per-step: must be a multiple of 8 (or equal G).  If a single
    # step would cover everything, split in two when possible so the
    # ("parallel",) axis keeps both v7x TensorCores busy.
    tg_req = max(1, tm // PACK)
    if tg_req >= G:
        half = _round_up((G + 1) // 2, PACK)
        tg = half if 0 < half < G else G
    else:
        tg = max(PACK, (tg_req // PACK) * PACK)
        if tg >= G:
            tg = G
    num_steps = pl.cdiv(G, tg)

    weight_bytes = sum(int(v.size) * v.dtype.itemsize for v in fused.values())
    cost = pl.CostEstimate(
        flops=int(2 * N * (dv * dhv + dq * dhq + R * dmm * (dhv + dhq) + R * dmm)),
        transcendentals=int(N * (dhv + dhq)),
        bytes_accessed=int(N * (dv + dq) * 4 + N * dmm * 4 + weight_bytes),
    )

    out8 = pl.pallas_call(
        mutan_kernel,
        out_shape=jax.ShapeDtypeStruct((G, PACK * dmm), jnp.float32),
        grid=(num_steps,),
        in_specs=[
            pl.BlockSpec((tg, PACK * dv), lambda i: (i, 0)),
            pl.BlockSpec((tg, PACK * dq), lambda i: (i, 0)),
            _full_spec(fused["w1"]),
            _full_spec(fused["b1"]),
            _full_spec(fused["w2"]),
            _full_spec(fused["b2"]),
            _full_spec(fused["s"]),
        ],
        out_specs=pl.BlockSpec((tg, PACK * dmm), lambda i: (i, 0)),
        compiler_params=pltpu.CompilerParams(
            dimension_semantics=("parallel",),
            vmem_limit_bytes=vmem_limit_bytes),
        cost_estimate=cost,
    )(xv8, xq8, fused["w1"], fused["b1"], fused["w2"], fused["b2"], fused["s"])

    out = out8.reshape(Npad, dmm)[:N]   # contiguous reshape + drop pad rows
    return out.reshape(B, W, dmm)


def mutan_fusion_2d_ref(input_v, input_q, params, opt):
    """Pure-JAX f32 reference of the PyTorch forward (eval mode)."""
    B, W, dv = input_v.shape
    N = B * W
    x_v = jnp.tanh(input_v.reshape(N, dv) @ params["wv"] + params["bv"])
    x_q = jnp.tanh(input_q.reshape(N, -1) @ params["wq"] + params["bq"])
    acc = jnp.zeros((N, opt["dim_mm"]), jnp.float32)
    for r in range(opt["R"]):
        hv = x_v @ params["whv"][r] + params["bhv"][r]
        hq = x_q @ params["whq"][r] + params["bhq"][r]
        acc = acc + hv * hq
    return acc.reshape(B, W, opt["dim_mm"])


if __name__ == "__main__":
    key = jax.random.PRNGKey(0)
    k_v, k_q, k_p, k_v2, k_q2, k_v3, k_q3 = jax.random.split(key, 7)

    params = init_params(k_p, OPT)
    fused_bf16 = prepare_fused_params(params, OPT, dtype=jnp.bfloat16)  # production
    fused_f32 = prepare_fused_params(params, OPT, dtype=jnp.float32)    # validation

    # Case 1: small "B regions x W proposals" input, single grid step.
    # f32-weight path validates the packing exactly; bf16 path with relaxed tol.
    B, W = 2, 8
    input_v = jax.random.normal(k_v, (B, W, OPT["dim_v"]), jnp.float32)
    input_q = jax.random.normal(k_q, (B, W, OPT["dim_q"]), jnp.float32)
    ref = mutan_fusion_2d_ref(input_v, input_q, params, OPT)
    out_f32 = jax.block_until_ready(mutan_fusion_2d(input_v, input_q, fused_f32, OPT))
    assert out_f32.shape == (B, W, OPT["dim_mm"])
    assert jnp.allclose(out_f32, ref, atol=3e-5, rtol=1e-3)
    out_bf16 = jax.block_until_ready(mutan_fusion_2d(input_v, input_q, fused_bf16, OPT))
    assert jnp.allclose(out_bf16, ref, atol=1e-2, rtol=5e-2)

    # Case 2: N=111 -> exercises the <=7-row PACK padding and the cdiv edge
    # block (no full-tile padding, garbage pad rows sliced away).
    B2, W2 = 3, 37
    input_v2 = jax.random.normal(k_v2, (B2, W2, OPT["dim_v"]), jnp.float32)
    input_q2 = jax.random.normal(k_q2, (B2, W2, OPT["dim_q"]), jnp.float32)
    ref2 = mutan_fusion_2d_ref(input_v2, input_q2, params, OPT)
    out2 = jax.block_until_ready(
        mutan_fusion_2d(input_v2, input_q2, fused_bf16, OPT, tm=64))
    assert out2.shape == (B2, W2, OPT["dim_mm"])
    assert jnp.allclose(out2, ref2, atol=1e-2, rtol=5e-2)

    # Case 3: larger N with the default tile -> exercises the >=2-step
    # (megacore-friendly) split of a tile that would otherwise cover everything.
    B3, W3 = 8, 128
    input_v3 = jax.random.normal(k_v3, (B3, W3, OPT["dim_v"]), jnp.float32)
    input_q3 = jax.random.normal(k_q3, (B3, W3, OPT["dim_q"]), jnp.float32)
    ref3 = mutan_fusion_2d_ref(input_v3, input_q3, params, OPT)
    out3 = jax.block_until_ready(mutan_fusion_2d(input_v3, input_q3, fused_bf16, OPT))
    assert out3.shape == (B3, W3, OPT["dim_mm"])
    assert jnp.allclose(out3, ref3, atol=1e-2, rtol=5e-2)

    print("KERNEL_OK")
</pallas_src>

<mosaic_0001>
module attributes {stable_mosaic.version = 11 : i64} {
  func.func @mutan_kernel(%arg0: i32, %arg1: memref<2x256xf32, #tpu.memory_space<vmem>>, %arg2: memref<2x256xf32, #tpu.memory_space<vmem>>, %arg3: memref<2x256x256xf32, #tpu.memory_space<vmem>>, %arg4: memref<2x1x256xf32, #tpu.memory_space<vmem>>, %arg5: memref<2x256x384xf32, #tpu.memory_space<vmem>>, %arg6: memref<2x1x384xf32, #tpu.memory_space<vmem>>, %arg7: memref<384x128xf32, #tpu.memory_space<vmem>>, %arg8: memref<2x128xf32, #tpu.memory_space<vmem>>) attributes {dimension_semantics = [#tpu.dimension_semantics<parallel>], iteration_bounds = array<i64: 1>, scalar_prefetch = 0 : i64, scratch_operands = 0 : i64, tpu.core_type = #tpu.core_type<tc>, window_params = [{transform_indices = @transform_0, window_bounds = array<i64: 2, 256>}, {transform_indices = @transform_1, window_bounds = array<i64: 2, 256>}, {pipeline_mode = #tpu.pipeline_mode<synchronous>, transform_indices = @transform_2, window_bounds = array<i64: 2, 256, 256>}, {pipeline_mode = #tpu.pipeline_mode<synchronous>, transform_indices = @transform_3, window_bounds = array<i64: 2, 1, 256>}, {pipeline_mode = #tpu.pipeline_mode<synchronous>, transform_indices = @transform_4, window_bounds = array<i64: 2, 256, 384>}, {pipeline_mode = #tpu.pipeline_mode<synchronous>, transform_indices = @transform_5, window_bounds = array<i64: 2, 1, 384>}, {pipeline_mode = #tpu.pipeline_mode<synchronous>, transform_indices = @transform_6, window_bounds = array<i64: 384, 128>}, {transform_indices = @transform_7, window_bounds = array<i64: 2, 128>}]} {
    %c0 = arith.constant 0 : index
    %c0_0 = arith.constant 0 : index
    %0 = vector.load %arg1[%c0, %c0_0] : memref<2x256xf32, #tpu.memory_space<vmem>>, vector<2x256xf32>
    %c0_1 = arith.constant 0 : index
    %c0_2 = arith.constant 0 : index
    %c0_3 = arith.constant 0 : index
    %1 = vector.load %arg3[%c0_1, %c0_2, %c0_3] : memref<2x256x256xf32, #tpu.memory_space<vmem>>, vector<1x256x256xf32>
    %2 = vector.shape_cast %1 : vector<1x256x256xf32> to vector<256x256xf32>
    %cst = arith.constant dense<0.000000e+00> : vector<2x256xf32>
    %3 = tpu.matmul %0, %2, %cst {dimension_numbers = #tpu.dot_dimension_numbers<[1], [0], [0], [1], [0, 0, 1, 1], [], []>} : vector<2x256xf32>, vector<256x256xf32>, vector<2x256xf32> -> vector<2x256xf32>
    %c0_4 = arith.constant 0 : index
    %c0_5 = arith.constant 0 : index
    %c0_6 = arith.constant 0 : index
    %4 = vector.load %arg4[%c0_4, %c0_5, %c0_6] : memref<2x1x256xf32, #tpu.memory_space<vmem>>, vector<1x1x256xf32>
    %5 = vector.shape_cast %4 : vector<1x1x256xf32> to vector<1x256xf32>
    %6 = vector.broadcast %5 : vector<1x256xf32> to vector<2x256xf32>
    %7 = arith.addf %3, %6 : vector<2x256xf32>
    %8 = math.tanh %7 : vector<2x256xf32>
    %c0_7 = arith.constant 0 : index
    %c0_8 = arith.constant 0 : index
    %9 = vector.load %arg2[%c0_7, %c0_8] : memref<2x256xf32, #tpu.memory_space<vmem>>, vector<2x256xf32>
    %c1 = arith.constant 1 : index
    %c0_9 = arith.constant 0 : index
    %c0_10 = arith.constant 0 : index
    %10 = vector.load %arg3[%c1, %c0_9, %c0_10] : memref<2x256x256xf32, #tpu.memory_space<vmem>>, vector<1x256x256xf32>
    %11 = vector.shape_cast %10 : vector<1x256x256xf32> to vector<256x256xf32>
    %cst_11 = arith.constant dense<0.000000e+00> : vector<2x256xf32>
    %12 = tpu.matmul %9, %11, %cst_11 {dimension_numbers = #tpu.dot_dimension_numbers<[1], [0], [0], [1], [0, 0, 1, 1], [], []>} : vector<2x256xf32>, vector<256x256xf32>, vector<2x256xf32> -> vector<2x256xf32>
    %c1_12 = arith.constant 1 : index
    %c0_13 = arith.constant 0 : index
    %c0_14 = arith.constant 0 : index
    %13 = vector.load %arg4[%c1_12, %c0_13, %c0_14] : memref<2x1x256xf32, #tpu.memory_space<vmem>>, vector<1x1x256xf32>
    %14 = vector.shape_cast %13 : vector<1x1x256xf32> to vector<1x256xf32>
    %15 = vector.broadcast %14 : vector<1x256xf32> to vector<2x256xf32>
    %16 = arith.addf %12, %15 : vector<2x256xf32>
    %17 = math.tanh %16 : vector<2x256xf32>
    %c0_15 = arith.constant 0 : index
    %c0_16 = arith.constant 0 : index
    %c0_17 = arith.constant 0 : index
    %18 = vector.load %arg5[%c0_15, %c0_16, %c0_17] : memref<2x256x384xf32, #tpu.memory_space<vmem>>, vector<1x256x384xf32>
    %19 = vector.shape_cast %18 : vector<1x256x384xf32> to vector<256x384xf32>
    %cst_18 = arith.constant dense<0.000000e+00> : vector<2x384xf32>
    %20 = tpu.matmul %8, %19, %cst_18 {dimension_numbers = #tpu.dot_dimension_numbers<[1], [0], [0], [1], [0, 0, 1, 1], [], []>} : vector<2x256xf32>, vector<256x384xf32>, vector<2x384xf32> -> vector<2x384xf32>
    %c0_19 = arith.constant 0 : index
    %c0_20 = arith.constant 0 : index
    %c0_21 = arith.constant 0 : index
    %21 = vector.load %arg6[%c0_19, %c0_20, %c0_21] : memref<2x1x384xf32, #tpu.memory_space<vmem>>, vector<1x1x384xf32>
    %22 = vector.shape_cast %21 : vector<1x1x384xf32> to vector<1x384xf32>
    %23 = vector.broadcast %22 : vector<1x384xf32> to vector<2x384xf32>
    %24 = arith.addf %20, %23 : vector<2x384xf32>
    %c1_22 = arith.constant 1 : index
    %c0_23 = arith.constant 0 : index
    %c0_24 = arith.constant 0 : index
    %25 = vector.load %arg5[%c1_22, %c0_23, %c0_24] : memref<2x256x384xf32, #tpu.memory_space<vmem>>, vector<1x256x384xf32>
    %26 = vector.shape_cast %25 : vector<1x256x384xf32> to vector<256x384xf32>
    %cst_25 = arith.constant dense<0.000000e+00> : vector<2x384xf32>
    %27 = tpu.matmul %17, %26, %cst_25 {dimension_numbers = #tpu.dot_dimension_numbers<[1], [0], [0], [1], [0, 0, 1, 1], [], []>} : vector<2x256xf32>, vector<256x384xf32>, vector<2x384xf32> -> vector<2x384xf32>
    %c1_26 = arith.constant 1 : index
    %c0_27 = arith.constant 0 : index
    %c0_28 = arith.constant 0 : index
    %28 = vector.load %arg6[%c1_26, %c0_27, %c0_28] : memref<2x1x384xf32, #tpu.memory_space<vmem>>, vector<1x1x384xf32>
    %29 = vector.shape_cast %28 : vector<1x1x384xf32> to vector<1x384xf32>
    %30 = vector.broadcast %29 : vector<1x384xf32> to vector<2x384xf32>
    %31 = arith.addf %27, %30 : vector<2x384xf32>
    %32 = arith.mulf %24, %31 : vector<2x384xf32>
    %c0_29 = arith.constant 0 : index
    %c0_30 = arith.constant 0 : index
    %33 = vector.load %arg7[%c0_29, %c0_30] : memref<384x128xf32, #tpu.memory_space<vmem>>, vector<384x128xf32>
    %cst_31 = arith.constant dense<0.000000e+00> : vector<2x128xf32>
    %34 = tpu.matmul %32, %33, %cst_31 {dimension_numbers = #tpu.dot_dimension_numbers<[1], [0], [0], [1], [0, 0, 1, 1], [], []>} : vector<2x384xf32>, vector<384x128xf32>, vector<2x128xf32> -> vector<2x128xf32>
    %c0_32 = arith.constant 0 : index
    %c0_33 = arith.constant 0 : index
    %35 = vector.load %arg8[%c0_32, %c0_33] : memref<2x128xf32, #tpu.memory_space<vmem>>, vector<2x128xf32>
    tpu.vector_store %arg8[%c0_32, %c0_33], %34 {strides = array<i32>} : memref<2x128xf32, #tpu.memory_space<vmem>>, vector<2x128xf32>,
    return
  }
  func.func @transform_0(%arg0: i32) -> (i32, i32) {
    %c0_i32 = arith.constant 0 : i32
    %c0_i32_0 = arith.constant 0 : i32
    return %arg0, %c0_i32 : i32, i32
  }
  func.func @transform_1(%arg0: i32) -> (i32, i32) {
    %c0_i32 = arith.constant 0 : i32
    %c0_i32_0 = arith.constant 0 : i32
    return %arg0, %c0_i32 : i32, i32
  }
  func.func @transform_2(%arg0: i32) -> (i32, i32, i32) {
    %c0_i32 = arith.constant 0 : i32
    %c0_i32_0 = arith.constant 0 : i32
    %c0_i32_1 = arith.constant 0 : i32
    %c0_i32_2 = arith.constant 0 : i32
    return %c0_i32, %c0_i32_0, %c0_i32_1 : i32, i32, i32
  }
  func.func @transform_3(%arg0: i32) -> (i32, i32, i32) {
    %c0_i32 = arith.constant 0 : i32
    %c0_i32_0 = arith.constant 0 : i32
    %c0_i32_1 = arith.constant 0 : i32
    %c0_i32_2 = arith.constant 0 : i32
    return %c0_i32, %c0_i32_0, %c0_i32_1 : i32, i32, i32
  }
  func.func @transform_4(%arg0: i32) -> (i32, i32, i32) {
    %c0_i32 = arith.constant 0 : i32
    %c0_i32_0 = arith.constant 0 : i32
    %c0_i32_1 = arith.constant 0 : i32
    %c0_i32_2 = arith.constant 0 : i32
    return %c0_i32, %c0_i32_0, %c0_i32_1 : i32, i32, i32
  }
  func.func @transform_5(%arg0: i32) -> (i32, i32, i32) {
    %c0_i32 = arith.constant 0 : i32
    %c0_i32_0 = arith.constant 0 : i32
    %c0_i32_1 = arith.constant 0 : i32
    %c0_i32_2 = arith.constant 0 : i32
    return %c0_i32, %c0_i32_0, %c0_i32_1 : i32, i32, i32
  }
  func.func @transform_6(%arg0: i32) -> (i32, i32) {
    %c0_i32 = arith.constant 0 : i32
    %c0_i32_0 = arith.constant 0 : i32
    %c0_i32_1 = arith.constant 0 : i32
    return %c0_i32, %c0_i32_0 : i32, i32
  }
  func.func @transform_7(%arg0: i32) -> (i32, i32) {
    %c0_i32 = arith.constant 0 : i32
    %c0_i32_0 = arith.constant 0 : i32
    return %arg0, %c0_i32 : i32, i32
  }
}

</mosaic_0001>

<bundles_post_ra>
// kernel: tpu_custom_call.1
= control target key start
LH: loop header
LB: loop body
LE: loop exit
PB: predicated region body
PF: predicated region fallthrough
CT: control target
= control target key end

     0   :  { %12 = vsyncpa [#allocation3], 0  ;;  %s2021_s0 = inlined_call_operand.hbm [shape: f32[2,256], index: 0, kind: input, shape index: {}]   ;;  %s2022_s1 = inlined_call_operand.hbm [shape: f32[2,256], index: 1, kind: input, shape index: {}]   ;;  %s2023_s2 = inlined_call_operand.hbm [shape: f32[2,256,256], index: 2, kind: input, shape index: {}]   ;;  %s2024_s3 = inlined_call_operand.vmem [shape: f32[2,1,256], index: 3, kind: input, shape index: {}]   ;;  %s2025_s4 = inlined_call_operand.hbm [shape: f32[2,256,384], index: 4, kind: input, shape index: {}]   ;;  %s2026_s5 = inlined_call_operand.vmem [shape: f32[2,1,384], index: 5, kind: input, shape index: {}]   ;;  %s2027_s6 = inlined_call_operand.hbm [shape: f32[384,128], index: 6, kind: input, shape index: {}]   ;;  %s2028_s7 = inlined_call_operand.hbm [shape: f32[2,128], index: 7, kind: output, shape index: {}]  }
   0x1   :  { %13 = vsyncpa [#allocation6], 0 }
   0x2   :  { %14 = vsyncpa [#allocation9], 0 }
   0x3   :  { %15 = vsyncpa [#allocation4], 0  ;;  %s1834_s24 = smov [#allocation5]   ;;  %s1835_s26 = smov [#allocation8]  }
   0x4   :  { %s32_s25 = sshll.u32 %s1834_s24, 4  ;;  %s55_s27 = sshll.u32 %s1835_s26, 4  ;;  %s33_s25 = int_to_ptr.vmem [resolvable:$true] %s32_s25  ;;  %s1889_s27 = int_to_ptr.vmem [resolvable:$true] %s55_s27 }
   0x5   :  { %s1694_s30 = scalar_lea.hbm %s2022_s1, 64 }
   0x6   :  { %p1695_p0 = scmp.ne.s32.totalorder %s2022_s1, %s1694_s30  ;;  %p1698_p1 = scmp.lt.u32.totalorder %s1694_s30, %s2022_s1 }
   0x8   :  { %p1700_p2 = pnand %p1698_p1, %p1695_p0 }
   0xa   :  { %1703 = shalt.err (!%p1700_p2)
}
   0xb   :  { %s1704_s12 = scalar_lea.vmem %s33_s25, 64  ;;  %p1709_p4 = scmp.lt.s32.totalorder %s33_s25, %s33_s25 }
   0xc   :  { %p1705_p3 = scmp.ne.s32.totalorder %s33_s25, %s1704_s12  ;;  %p1710_p5 = scmp.lt.s32.totalorder %s1704_s12, %s1704_s12 }
   0xe   :  { %p1711_p6 = por %p1710_p5, %p1709_p4 }
  0x10   :  { %p1712_p7 = pnand %p1711_p6, %p1705_p3 }
  0x12   :  { %1715 = shalt.err (!%p1712_p7)
}
  0x13   :  { %35 = dma.hbm_to_vmem [thread:$0]  %s2022_s1, 64, %s33_s25, [#allocation6]  }
  0x14   :  { %s1716_s17 = scalar_lea.hbm %s2025_s4, 24576 }
  0x15   :  { %p1717_p8 = scmp.ne.s32.totalorder %s2025_s4, %s1716_s17  ;;  %p1720_p9 = scmp.lt.u32.totalorder %s1716_s17, %s2025_s4 }
  0x17   :  { %p1722_p10 = pnand %p1720_p9, %p1717_p8 }
  0x19   :  { %1725 = shalt.err (!%p1722_p10)
}
  0x1a   :  { %s1726_s22 = scalar_lea.vmem %s1889_s27, 24576  ;;  %p1731_p12 = scmp.lt.s32.totalorder %s1889_s27, %s1889_s27 }
  0x1b   :  { %p1727_p11 = scmp.ne.s32.totalorder %s1889_s27, %s1726_s22  ;;  %p1732_p13 = scmp.lt.s32.totalorder %s1726_s22, %s1726_s22 }
  0x1d   :  { %p1733_p0 = por %p1732_p13, %p1731_p12 }
  0x1f   :  { %p1734_p1 = pnand %p1733_p0, %p1727_p11 }
  0x21   :  { %1737 = shalt.err (!%p1734_p1)
}
  0x22   :  { %s1836_s1 = smov 384   ;;  %s1837_s23 = smov 24  }
  0x23   :  { %61 = dma.hbm_to_vmem [thread:$0]  %s2025_s4, 24576, %s1889_s27, [#allocation9], %s1836_s1, %s1836_s1, %s1837_s23  }
  0x24   :  { %s1838_s26 = smov [#allocation2]   ;;  %s1839_s29 = smov [#allocation7]  }
  0x25   :  { %s22_s28 = sshll.u32 %s1838_s26, 4  ;;  %s41_s30 = sshll.u32 %s1839_s29, 4  ;;  %s23_s28 = int_to_ptr.vmem [resolvable:$true] %s22_s28  ;;  %s1920_s30 = int_to_ptr.vmem [resolvable:$true] %s41_s30 }
  0x26   :  { %s1738_s10 = scalar_lea.hbm %s2021_s0, 64 }
  0x27   :  { %p1739_p2 = scmp.ne.s32.totalorder %s2021_s0, %s1738_s10  ;;  %p1742_p3 = scmp.lt.u32.totalorder %s1738_s10, %s2021_s0 }
  0x29   :  { %p1744_p4 = pnand %p1742_p3, %p1739_p2 }
  0x2b   :  { %1747 = shalt.err (!%p1744_p4)
}
  0x2c   :  { %s1748_s4 = scalar_lea.vmem %s23_s28, 64  ;;  %p1753_p6 = scmp.lt.s32.totalorder %s23_s28, %s23_s28 }
  0x2d   :  { %p1749_p5 = scmp.ne.s32.totalorder %s23_s28, %s1748_s4  ;;  %p1754_p7 = scmp.lt.s32.totalorder %s1748_s4, %s1748_s4 }
  0x2f   :  { %p1755_p8 = por %p1754_p7, %p1753_p6 }
  0x31   :  { %p1756_p9 = pnand %p1755_p8, %p1749_p5 }
  0x33   :  { %1759 = shalt.err (!%p1756_p9)
}
  0x34   :  { %25 = dma.hbm_to_vmem [thread:$0]  %s2021_s0, 64, %s23_s28, [#allocation3]  }
  0x35   :  { %s1760_s18 = scalar_lea.hbm %s2023_s2, 16384 }
  0x36   :  { %p1761_p10 = scmp.ne.s32.totalorder %s2023_s2, %s1760_s18  ;;  %p1764_p11 = scmp.lt.u32.totalorder %s1760_s18, %s2023_s2 }
  0x38   :  { %p1766_p12 = pnand %p1764_p11, %p1761_p10 }
  0x3a   :  { %1769 = shalt.err (!%p1766_p12)
}
  0x3b   :  { %s1770_s1 = scalar_lea.vmem %s1920_s30, 16384  ;;  %p1775_p0 = scmp.lt.s32.totalorder %s1920_s30, %s1920_s30 }
  0x3c   :  { %p1771_p13 = scmp.ne.s32.totalorder %s1920_s30, %s1770_s1  ;;  %p1776_p1 = scmp.lt.s32.totalorder %s1770_s1, %s1770_s1 }
  0x3e   :  { %p1777_p2 = por %p1776_p1, %p1775_p0 }
  0x40   :  { %p1778_p3 = pnand %p1777_p2, %p1771_p13 }
  0x42   :  { %1781 = shalt.err (!%p1778_p3)
}
  0x43   :  { %s1840_s0 = smov 256   ;;  %s1841_s23 = smov 16  }
  0x44   :  { %47 = dma.hbm_to_vmem [thread:$0]  %s2023_s2, 16384, %s1920_s30, [#allocation6], %s1840_s0, %s1840_s0, %s1841_s23  }
  0x45   :  { %s1842_s26 = smov [#allocation10]   ;;  %s1782_s9 = scalar_lea.hbm %s2027_s6, 6144 }
  0x46   :  { %s69_s28 = sshll.u32 %s1842_s26, 4  ;;  %p1783_p4 = scmp.ne.s32.totalorder %s2027_s6, %s1782_s9  ;;  %s70_s28 = int_to_ptr.vmem [resolvable:$true] %s69_s28 }
  0x47   :  { %p1786_p5 = scmp.lt.u32.totalorder %s1782_s9, %s2027_s6 }
  0x49   :  { %p1788_p6 = pnand %p1786_p5, %p1783_p4 }
  0x4b   :  { %1791 = shalt.err (!%p1788_p6)
}
  0x4c   :  { %s1792_s14 = scalar_lea.vmem %s70_s28, 6144  ;;  %p1797_p8 = scmp.lt.s32.totalorder %s70_s28, %s70_s28 }
  0x4d   :  { %p1793_p7 = scmp.ne.s32.totalorder %s70_s28, %s1792_s14  ;;  %p1798_p9 = scmp.lt.s32.totalorder %s1792_s14, %s1792_s14 }
  0x4f   :  { %p1799_p10 = por %p1798_p9, %p1797_p8 }
  0x51   :  { %p1800_p11 = pnand %p1799_p10, %p1793_p7 }
  0x53   :  { %1803 = shalt.err (!%p1800_p11)
}
  0x54   :  { %s1843_s2 = smov 128   ;;  %s1844_s30 = smov 8  }
  0x55   :  { %75 = dma.hbm_to_vmem [thread:$0]  %s2027_s6, 6144, %s70_s28, [#allocation9], %s1843_s2, %s1843_s2, %s1844_s30  }
  0x56   :  { %1826 = dma.done.wait [#allocation3], 64  }
  0x57   :  { %1827 = vsyncadd [#allocation3], 4294967232 }
  0x58   :  { %1828 = dma.done.wait [#allocation6], 16448  }
  0x59   :  { %1829 = vsyncadd [#allocation6], 4294950848 }
  0x5a   :  { %1830 = dma.done.wait [#allocation9], 30720  }
  0x5b   :  { %1831 = vsyncadd [#allocation9], 4294936576  ;;  %v93_v0 = vld [vmem:[#allocation7 + $0x8] sm:$0xff]  ;;  %v95_v1 = vld [vmem:[#allocation7 + $0x18] sm:$0xff]  ;;  %vm1846_vm0 = vmmov 0  }
  0x5c   :  { %v92_v2 = vld [vmem:[#allocation7] sm:$0xff]  ;;  %v1295_v3 = vpack.c.bf16 %v95_v1, %v93_v0  ;;  %v94_v4 = vld [vmem:[#allocation7 + $0x10] sm:$0xff]  ;;  %v97_v5 = vld [vmem:[#allocation7 + $0x28] sm:$0xff] }
  0x5d   :  { %v99_v6 = vld [vmem:[#allocation7 + $0x38] sm:$0xff]  ;;  %v1297_v7 = vpack.c.bf16 %v94_v4, %v92_v2  ;;  %v96_v9 = vld [vmem:[#allocation7 + $0x20] sm:$0xff]  ;;  %v98_v10 = vld [vmem:[#allocation7 + $0x30] sm:$0xff] }
  0x5e   :  { %v1299_v8 = vpack.c.bf16 %v99_v6, %v97_v5  ;;  %v101_v11 = vld [vmem:[#allocation7 + $0x48] sm:$0xff]  ;;  %1296 = vmatprep.subr.bf16.mxu0 %v1295_v3  ;;  %v103_v12 = vld [vmem:[#allocation7 + $0x58] sm:$0xff]  ;;  %v1301_v13 = vpack.c.bf16 %v98_v10, %v96_v9  ;;  %v100_v15 = vld [vmem:[#allocation7 + $0x40] sm:$0xff] }
  0x5f   :  { %1298 = vmatpush1.bf16.msra.mxu0 %v1297_v7  ;;  %v1303_v14 = vpack.c.bf16 %v103_v12, %v101_v11  ;;  %v102_v16 = vld [vmem:[#allocation7 + $0x50] sm:$0xff]  ;;  %v105_v17 = vld [vmem:[#allocation7 + $0x68] sm:$0xff]  ;;  %v107_v18 = vld [vmem:[#allocation7 + $0x78] sm:$0xff] }
  0x60   :  { %1300 = vmatprep.subr.bf16.mxu0 %v1299_v8  ;;  %v1305_v19 = vpack.c.bf16 %v102_v16, %v100_v15  ;;  %v1307_v20 = vpack.c.bf16 %v107_v18, %v105_v17  ;;  %v104_v21 = vld [vmem:[#allocation7 + $0x60] sm:$0xff]  ;;  %v106_v22 = vld [vmem:[#allocation7 + $0x70] sm:$0xff]  ;;  %v109_v23 = vld [vmem:[#allocation7 + $0x88] sm:$0xff] }
  0x61   :  { %v111_v24 = vld [vmem:[#allocation7 + $0x98] sm:$0xff]  ;;  %v255_v25 = vld [vmem:[#allocation7 + $0x208] sm:$0xff]  ;;  %v1309_v27 = vpack.c.bf16 %v106_v22, %v104_v21  ;;  %v108_v28 = vld [vmem:[#allocation7 + $0x80] sm:$0xff] }
  0x62   :  { %v257_v26 = vld [vmem:[#allocation7 + $0x218] sm:$0xff]  ;;  %v254_v30 = vld [vmem:[#allocation7 + $0x200] sm:$0xff]  ;;  %v256_v31 = vld [vmem:[#allocation7 + $0x210] sm:$0xff]  ;;  %v1311_v32 = vpack.c.bf16 %v111_v24, %v109_v23 }
  0x63   :  { %1302 = vmatpush1.bf16.msra.mxu0 %v1301_v13  ;;  %v1359_v29 = vpack.c.bf16 %v257_v26, %v255_v25  ;;  %v110_v33 = vld [vmem:[#allocation7 + $0x90] sm:$0xff]  ;;  %v1361_v34 = vpack.c.bf16 %v256_v31, %v254_v30  ;;  %v259_v35 = vld [vmem:[#allocation7 + $0x228] sm:$0xff]  ;;  %v261_v36 = vld [vmem:[#allocation7 + $0x238] sm:$0xff] }
  0x64   :  { %1304 = vmatprep.subr.bf16.mxu0 %v1303_v14  ;;  %v113_v37 = vld [vmem:[#allocation7 + $0xa8] sm:$0xff]  ;;  %v115_v38 = vld [vmem:[#allocation7 + $0xb8] sm:$0xff]  ;;  %v1363_v39 = vpack.c.bf16 %v261_v36, %v259_v35  ;;  %v258_v40 = vld [vmem:[#allocation7 + $0x220] sm:$0xff]  ;;  %v1313_v42 = vpack.c.bf16 %v110_v33, %v108_v28 }
  0x65   :  { %1360 = vmatprep.subr.bf16.mxu1 %v1359_v29  ;;  %v260_v41 = vld [vmem:[#allocation7 + $0x230] sm:$0xff]  ;;  %v112_v43 = vld [vmem:[#allocation7 + $0xa0] sm:$0xff]  ;;  %v263_v45 = vld [vmem:[#allocation7 + $0x248] sm:$0xff]  ;;  %v1315_v47 = vpack.c.bf16 %v115_v38, %v113_v37 }
  0x66   :  { %1362 = vmatpush1.bf16.msra.mxu1 %v1361_v34  ;;  %v1365_v44 = vpack.c.bf16 %v260_v41, %v258_v40  ;;  %v265_v46 = vld [vmem:[#allocation7 + $0x258] sm:$0xff]  ;;  %v114_v48 = vld [vmem:[#allocation7 + $0xb0] sm:$0xff]  ;;  %v262_v50 = vld [vmem:[#allocation7 + $0x240] sm:$0xff] }
  0x67   :  { %1306 = vmatpush1.bf16.msra.mxu0 %v1305_v19  ;;  %1364 = vmatprep.subr.bf16.mxu1 %v1363_v39  ;;  %v1367_v49 = vpack.c.bf16 %v265_v46, %v263_v45  ;;  %v264_v51 = vld [vmem:[#allocation7 + $0x250] sm:$0xff]  ;;  %v117_v52 = vld [vmem:[#allocation7 + $0xc8] sm:$0xff]  ;;  %v119_v53 = vld [vmem:[#allocation7 + $0xd8] sm:$0xff]  ;;  %v1317_v57 = vpack.c.bf16 %v114_v48, %v112_v43 }
  0x68   :  { %1308 = vmatprep.subr.bf16.mxu0 %v1307_v20  ;;  %v267_v54 = vld [vmem:[#allocation7 + $0x268] sm:$0xff]  ;;  %v1369_v55 = vpack.c.bf16 %v264_v51, %v262_v50  ;;  %v269_v56 = vld [vmem:[#allocation7 + $0x278] sm:$0xff]  ;;  %v116_v58 = vld [vmem:[#allocation7 + $0xc0] sm:$0xff]  ;;  %v1319_v62 = vpack.c.bf16 %v119_v53, %v117_v52 }
  0x69   :  { %v1371_v59 = vpack.c.bf16 %v269_v56, %v267_v54  ;;  %v266_v60 = vld [vmem:[#allocation7 + $0x260] sm:$0xff]  ;;  %v268_v61 = vld [vmem:[#allocation7 + $0x270] sm:$0xff]  ;;  %v271_v0 = vld [vmem:[#allocation7 + $0x288] sm:$0xff] }
  0x6a   :  { %1366 = vmatpush1.bf16.msra.mxu1 %v1365_v44  ;;  %v118_v63 = vld [vmem:[#allocation7 + $0xd0] sm:$0xff]  ;;  %v273_v1 = vld [vmem:[#allocation7 + $0x298] sm:$0xff]  ;;  %v121_v2 = vld [vmem:[#allocation7 + $0xe8] sm:$0xff]  ;;  %v1373_v4 = vpack.c.bf16 %v268_v61, %v266_v60 }
  0x6b   :  { %1310 = vmatpush1.bf16.msra.mxu0 %v1309_v27  ;;  %1368 = vmatprep.subr.bf16.mxu1 %v1367_v49  ;;  %v123_v3 = vld [vmem:[#allocation7 + $0xf8] sm:$0xff]  ;;  %v1321_v5 = vpack.c.bf16 %v118_v63, %v116_v58  ;;  %v120_v6 = vld [vmem:[#allocation7 + $0xe0] sm:$0xff]  ;;  %v1375_v7 = vpack.c.bf16 %v273_v1, %v271_v0  ;;  %v272_v9 = vld [vmem:[#allocation7 + $0x290] sm:$0xff] }
  0x6c   :  { %1312 = vmatprep.subr.bf16.mxu0 %v1311_v32  ;;  %v270_v8 = vld [vmem:[#allocation7 + $0x280] sm:$0xff]  ;;  %v1323_v10 = vpack.c.bf16 %v123_v3, %v121_v2  ;;  %v122_v11 = vld [vmem:[#allocation7 + $0xf0] sm:$0xff]  ;;  %v275_v12 = vld [vmem:[#allocation7 + $0x2a8] sm:$0xff] }
  0x6d   :  { %v277_v13 = vld [vmem:[#allocation7 + $0x2b8] sm:$0xff]  ;;  %v125_v14 = vld [vmem:[#allocation7 + $0x108] sm:$0xff]  ;;  %v1377_v16 = vpack.c.bf16 %v272_v9, %v270_v8  ;;  %v1325_v17 = vpack.c.bf16 %v122_v11, %v120_v6  ;;  %v124_v18 = vld [vmem:[#allocation7 + $0x100] sm:$0xff] }
  0x6e   :  { %1370 = vmatpush1.bf16.msra.mxu1 %v1369_v55  ;;  %v127_v15 = vld [vmem:[#allocation7 + $0x118] sm:$0xff]  ;;  %v1379_v19 = vpack.c.bf16 %v277_v13, %v275_v12  ;;  %v274_v20 = vld [vmem:[#allocation7 + $0x2a0] sm:$0xff]  ;;  %v276_v21 = vld [vmem:[#allocation7 + $0x2b0] sm:$0xff] }
  0x6f   :  { %1314 = vmatpush1.bf16.msra.mxu0 %v1313_v42  ;;  %1372 = vmatprep.subr.bf16.mxu1 %v1371_v59  ;;  %v1327_v22 = vpack.c.bf16 %v127_v15, %v125_v14  ;;  %v126_v23 = vld [vmem:[#allocation7 + $0x110] sm:$0xff]  ;;  %v279_v24 = vld [vmem:[#allocation7 + $0x2c8] sm:$0xff]  ;;  %v281_v25 = vld [vmem:[#allocation7 + $0x2d8] sm:$0xff]  ;;  %v1381_v29 = vpack.c.bf16 %v276_v21, %v274_v20 }
  0x70   :  { %1316 = vmatprep.subr.bf16.mxu0 %v1315_v47  ;;  %v129_v26 = vld [vmem:[#allocation7 + $0x128] sm:$0xff]  ;;  %v131_v27 = vld [vmem:[#allocation7 + $0x138] sm:$0xff]  ;;  %v128_v28 = vld [vmem:[#allocation7 + $0x120] sm:$0xff]  ;;  %v1329_v30 = vpack.c.bf16 %v126_v23, %v124_v18  ;;  %v1383_v31 = vpack.c.bf16 %v281_v25, %v279_v24 }
  0x71   :  { %v278_v32 = vld [vmem:[#allocation7 + $0x2c0] sm:$0xff]  ;;  %v280_v33 = vld [vmem:[#allocation7 + $0x2d0] sm:$0xff]  ;;  %v1963_v34 = vld.sshfl [vmem:[#allocation2] sm:$0x33 pattern:$0x76325410]  ;;  %v1331_v35 = vpack.c.bf16 %v131_v27, %v129_v26 }
  0x72   :  { %1374 = vmatpush1.bf16.msra.mxu1 %v1373_v4  ;;  %v130_v36 = vld [vmem:[#allocation7 + $0x130] sm:$0xff]  ;;  %v283_v37 = vld [vmem:[#allocation7 + $0x2e8] sm:$0xff]  ;;  %v285_v38 = vld [vmem:[#allocation7 + $0x2f8] sm:$0xff]  ;;  %v176_v39 = vcombine.high %v1963_v34, %v1963_v34  ;;  %v1385_v42 = vpack.c.bf16 %v280_v33, %v278_v32 }
  0x73   :  { %1318 = vmatpush1.bf16.msra.mxu0 %v1317_v57  ;;  %1376 = vmatprep.subr.bf16.mxu1 %v1375_v7  ;;  %v133_v40 = vld [vmem:[#allocation7 + $0x148] sm:$0xff]  ;;  %v135_v41 = vld [vmem:[#allocation7 + $0x158] sm:$0xff]  ;;  %v1333_v43 = vpack.c.bf16 %v130_v36, %v128_v28  ;;  %v132_v44 = vld [vmem:[#allocation7 + $0x140] sm:$0xff]  ;;  %v1387_v45 = vpack.c.bf16 %v285_v38, %v283_v37 }
  0x74   :  { %1320 = vmatprep.subr.bf16.mxu0 %v1319_v62  ;;  %243 = vmatprep.mubr.f32.mxu0 %v176_v39  ;;  %v282_v46 = vld [vmem:[#allocation7 + $0x2e0] sm:$0xff]  ;;  %v284_v47 = vld [vmem:[#allocation7 + $0x2f0] sm:$0xff]  ;;  %v1335_v48 = vpack.c.bf16 %v135_v41, %v133_v40  ;;  %v287_v50 = vld [vmem:[#allocation7 + $0x308] sm:$0xff] }
  0x75   :  { %v134_v49 = vld [vmem:[#allocation7 + $0x150] sm:$0xff]  ;;  %v289_v51 = vld [vmem:[#allocation7 + $0x318] sm:$0xff]  ;;  %v137_v52 = vld [vmem:[#allocation7 + $0x168] sm:$0xff]  ;;  %v1389_v54 = vpack.c.bf16 %v284_v47, %v282_v46 }
  0x76   :  { %1378 = vmatpush1.bf16.msra.mxu1 %v1377_v16  ;;  %v139_v53 = vld [vmem:[#allocation7 + $0x178] sm:$0xff]  ;;  %v1337_v55 = vpack.c.bf16 %v134_v49, %v132_v44  ;;  %v136_v56 = vld [vmem:[#allocation7 + $0x160] sm:$0xff]  ;;  %v1391_v57 = vpack.c.bf16 %v289_v51, %v287_v50  ;;  %v288_v59 = vld [vmem:[#allocation7 + $0x310] sm:$0xff] }
  0x77   :  { %1322 = vmatpush1.bf16.msra.mxu0 %v1321_v5  ;;  %1380 = vmatprep.subr.bf16.mxu1 %v1379_v19  ;;  %v286_v58 = vld [vmem:[#allocation7 + $0x300] sm:$0xff]  ;;  %v1339_v60 = vpack.c.bf16 %v139_v53, %v137_v52  ;;  %v138_v61 = vld [vmem:[#allocation7 + $0x170] sm:$0xff]  ;;  %v291_v62 = vld [vmem:[#allocation7 + $0x328] sm:$0xff] }
  0x78   :  { %1324 = vmatprep.subr.bf16.mxu0 %v1323_v10  ;;  %v293_v63 = vld [vmem:[#allocation7 + $0x338] sm:$0xff]  ;;  %v141_v0 = vld [vmem:[#allocation7 + $0x188] sm:$0xff]  ;;  %v1393_v2 = vpack.c.bf16 %v288_v59, %v286_v58  ;;  %v1341_v4 = vpack.c.bf16 %v138_v61, %v136_v56  ;;  %v140_v5 = vld [vmem:[#allocation7 + $0x180] sm:$0xff] }
  0x79   :  { %v143_v1 = vld [vmem:[#allocation7 + $0x198] sm:$0xff]  ;;  %v1395_v6 = vpack.c.bf16 %v293_v63, %v291_v62  ;;  %v290_v7 = vld [vmem:[#allocation7 + $0x320] sm:$0xff]  ;;  %v292_v8 = vld [vmem:[#allocation7 + $0x330] sm:$0xff] }
  0x7a   :  { %1382 = vmatpush1.bf16.msra.mxu1 %v1381_v29  ;;  %v1967_v3 = vld.sshfl [vmem:[#allocation5] sm:$0x33 pattern:$0x76325410]  ;;  %v1343_v10 = vpack.c.bf16 %v143_v1, %v141_v0  ;;  %v142_v11 = vld [vmem:[#allocation7 + $0x190] sm:$0xff]  ;;  %v295_v12 = vld [vmem:[#allocation7 + $0x348] sm:$0xff]  ;;  %v1397_v16 = vpack.c.bf16 %v292_v8, %v290_v7 }
  0x7b   :  { %1326 = vmatpush1.bf16.msra.mxu0 %v1325_v17  ;;  %1384 = vmatprep.subr.bf16.mxu1 %v1383_v31  ;;  %v339_v9 = vcombine.high %v1967_v3, %v1967_v3  ;;  %v297_v13 = vld [vmem:[#allocation7 + $0x358] sm:$0xff]  ;;  %v145_v14 = vld [vmem:[#allocation7 + $0x1a8] sm:$0xff]  ;;  %v1345_v17 = vpack.c.bf16 %v142_v11, %v140_v5  ;;  %v144_v18 = vld [vmem:[#allocation7 + $0x1a0] sm:$0xff] }
  0x7c   :  { %1328 = vmatprep.subr.bf16.mxu0 %v1327_v22  ;;  %v147_v15 = vld [vmem:[#allocation7 + $0x1b8] sm:$0xff]  ;;  %v1399_v19 = vpack.c.bf16 %v297_v13, %v295_v12  ;;  %v294_v20 = vld [vmem:[#allocation7 + $0x340] sm:$0xff]  ;;  %v296_v21 = vld [vmem:[#allocation7 + $0x350] sm:$0xff] }
  0x7d   :  { %406 = vmatprep.mubr.f32.mxu1 %v339_v9  ;;  %v1347_v22 = vpack.c.bf16 %v147_v15, %v145_v14  ;;  %v146_v23 = vld [vmem:[#allocation7 + $0x1b0] sm:$0xff]  ;;  %v299_v24 = vld [vmem:[#allocation7 + $0x368] sm:$0xff]  ;;  %v301_v25 = vld [vmem:[#allocation7 + $0x378] sm:$0xff]  ;;  %v1401_v28 = vpack.c.bf16 %v296_v21, %v294_v20 }
  0x7e   :  { %1386 = vmatpush1.bf16.msra.mxu1 %v1385_v42  ;;  %v149_v26 = vld [vmem:[#allocation7 + $0x1c8] sm:$0xff]  ;;  %v151_v27 = vld [vmem:[#allocation7 + $0x1d8] sm:$0xff]  ;;  %v1349_v29 = vpack.c.bf16 %v146_v23, %v144_v18  ;;  %v1403_v31 = vpack.c.bf16 %v301_v25, %v299_v24  ;;  %v298_v32 = vld [vmem:[#allocation7 + $0x360] sm:$0xff] }
  0x7f   :  { %1330 = vmatpush1.bf16.msra.mxu0 %v1329_v30  ;;  %1388 = vmatprep.subr.bf16.mxu1 %v1387_v45  ;;  %v148_v30 = vld [vmem:[#allocation7 + $0x1c0] sm:$0xff]  ;;  %v300_v33 = vld [vmem:[#allocation7 + $0x370] sm:$0xff]  ;;  %v303_v37 = vld [vmem:[#allocation7 + $0x388] sm:$0xff] }
  0x80   :  { %1332 = vmatprep.subr.bf16.mxu0 %v1331_v35  ;;  %v1351_v35 = vpack.c.bf16 %v151_v27, %v149_v26  ;;  %v150_v36 = vld [vmem:[#allocation7 + $0x1d0] sm:$0xff]  ;;  %v305_v38 = vld [vmem:[#allocation7 + $0x398] sm:$0xff]  ;;  %v153_v39 = vld [vmem:[#allocation7 + $0x1e8] sm:$0xff]  ;;  %v1405_v41 = vpack.c.bf16 %v300_v33, %v298_v32 }
  0x81   :  { %v155_v40 = vld [vmem:[#allocation7 + $0x1f8] sm:$0xff]  ;;  %v1353_v42 = vpack.c.bf16 %v150_v36, %v148_v30  ;;  %v1407_v44 = vpack.c.bf16 %v305_v38, %v303_v37  ;;  %v302_v45 = vld [vmem:[#allocation7 + $0x380] sm:$0xff]  ;;  %v304_v46 = vld [vmem:[#allocation7 + $0x390] sm:$0xff] }
  0x82   :  { %1390 = vmatpush1.bf16.msra.mxu1 %v1389_v54  ;;  %v1355_v47 = vpack.c.bf16 %v155_v40, %v153_v39  ;;  %v307_v49 = vld [vmem:[#allocation7 + $0x3a8] sm:$0xff]  ;;  %v309_v50 = vld [vmem:[#allocation7 + $0x3b8] sm:$0xff]  ;;  %v419_v52 = vld [vmem:[#allocation8 + $0x20] sm:$0xff]  ;;  %v1409_v53 = vpack.c.bf16 %v304_v46, %v302_v45 }
  0x83   :  { %1334 = vmatpush1.bf16.msra.mxu0 %v1333_v43  ;;  %1392 = vmatprep.subr.bf16.mxu1 %v1391_v57  ;;  %v152_v43 = vld [vmem:[#allocation7 + $0x1e0] sm:$0xff]  ;;  %v416_v51 = vld [vmem:[#allocation8 + $0x8] sm:$0xff]  ;;  %v308_v57 = vld [vmem:[#allocation7 + $0x3b0] sm:$0xff] }
  0x84   :  { %1336 = vmatprep.subr.bf16.mxu0 %v1335_v48  ;;  %v154_v48 = vld [vmem:[#allocation7 + $0x1f0] sm:$0xff]  ;;  %v306_v56 = vld [vmem:[#allocation7 + $0x3a0] sm:$0xff]  ;;  %v311_v58 = vld [vmem:[#allocation7 + $0x3c8] sm:$0xff] }
  0x85   :  { %v1357_v54 = vpack.c.bf16 %v154_v48, %v152_v43  ;;  %v313_v59 = vld [vmem:[#allocation7 + $0x3d8] sm:$0xff]  ;;  %v415_v61 = vld [vmem:[#allocation8] sm:$0xff]  ;;  %v425_v0 = vld [vmem:[#allocation8 + $0x50] sm:$0xff]  ;;  %v1413_v1 = vpack.c.bf16 %v308_v57, %v306_v56 }
  0x86   :  { %1394 = vmatpush1.bf16.msra.mxu1 %v1393_v2  ;;  %v418_v62 = vld [vmem:[#allocation8 + $0x18] sm:$0xff]  ;;  %v1415_v2 = vpack.c.bf16 %v313_v59, %v311_v58  ;;  %v312_v5 = vld [vmem:[#allocation7 + $0x3d0] sm:$0xff]  ;;  %v424_v11 = vld [vmem:[#allocation8 + $0x48] sm:$0xff] }
  0x87   :  { %1338 = vmatpush1.bf16.msra.mxu0 %v1337_v55  ;;  %1396 = vmatprep.subr.bf16.mxu1 %v1395_v6  ;;  %v1411_v55 = vpack.c.bf16 %v309_v50, %v307_v49  ;;  %v422_v63 = vld [vmem:[#allocation8 + $0x38] sm:$0xff]  ;;  %v315_v6 = vld [vmem:[#allocation7 + $0x3e8] sm:$0xff]  ;;  %v1425_v7 = vpack.c.bf16 %v418_v62, %v415_v61  ;;  %v431_v13 = vld [vmem:[#allocation8 + $0x80] sm:$0xff] }
  0x88   :  { %1340 = vmatprep.subr.bf16.mxu0 %v1339_v60  ;;  %v1423_v60 = vpack.c.bf16 %v419_v52, %v416_v51  ;;  %v317_v8 = vld [vmem:[#allocation7 + $0x3f8] sm:$0xff]  ;;  %v1427_v9 = vpack.c.bf16 %v425_v0, %v422_v63  ;;  %v428_v12 = vld [vmem:[#allocation8 + $0x68] sm:$0xff]  ;;  %v437_v25 = vld [vmem:[#allocation8 + $0xb0] sm:$0xff] }
  0x89   :  { %v1419_v15 = vpack.c.bf16 %v317_v8, %v315_v6  ;;  %v1431_v20 = vpack.c.bf16 %v431_v13, %v428_v12  ;;  %v430_v21 = vld [vmem:[#allocation8 + $0x78] sm:$0xff]  ;;  %v468_v23 = vld [vmem:[#allocation8 + $0x1a8] sm:$0xff]  ;;  %v433_v27 = vld [vmem:[#allocation8 + $0x90] sm:$0xff] }
  0x8a   :  { %1398 = vmatpush1.bf16.msra.mxu1 %v1397_v16  ;;  %v314_v16 = vld [vmem:[#allocation7 + $0x3e0] sm:$0xff]  ;;  %v434_v24 = vld [vmem:[#allocation8 + $0x98] sm:$0xff]  ;;  %v420_v30 = vld [vmem:[#allocation8 + $0x28] sm:$0xff] }
  0x8b   :  { %1342 = vmatpush1.bf16.msra.mxu0 %v1341_v4  ;;  %1400 = vmatprep.subr.bf16.mxu1 %v1399_v19  ;;  %v310_v4 = vld [vmem:[#allocation7 + $0x3c0] sm:$0xff]  ;;  %v436_v32 = vld [vmem:[#allocation8 + $0xa8] sm:$0xff]  ;;  %v426_v43 = vld [vmem:[#allocation8 + $0x58] sm:$0xff] }
  0x8c   :  { %1344 = vmatprep.subr.bf16.mxu0 %v1343_v10  ;;  %v421_v10 = vld [vmem:[#allocation8 + $0x30] sm:$0xff]  ;;  %v1417_v14 = vpack.c.bf16 %v312_v5, %v310_v4  ;;  %v427_v19 = vld [vmem:[#allocation8 + $0x60] sm:$0xff]  ;;  %v440_v36 = vld [vmem:[#allocation8 + $0xc8] sm:$0xff]  ;;  %v1437_v39 = vpack.c.bf16 %v436_v32, %v433_v27 }
  0x8d   :  { %v1429_v18 = vpack.c.bf16 %v424_v11, %v421_v10  ;;  %v471_v33 = vld [vmem:[#allocation8 + $0x1c0] sm:$0xff]  ;;  %v442_v45 = vld [vmem:[#allocation8 + $0xd8] sm:$0xff]  ;;  %v477_v46 = vld [vmem:[#allocation8 + $0x1f0] sm:$0xff] }
  0x8e   :  { %1402 = vmatpush1.bf16.msra.mxu1 %v1401_v28  ;;  %v443_v37 = vld [vmem:[#allocation8 + $0xe0] sm:$0xff]  ;;  %v446_v48 = vld [vmem:[#allocation8 + $0xf8] sm:$0xff]  ;;  %v449_v49 = vld [vmem:[#allocation8 + $0x110] sm:$0xff] }
  0x8f   :  { %1346 = vmatpush1.bf16.msra.mxu0 %v1345_v17  ;;  %1404 = vmatprep.subr.bf16.mxu1 %v1403_v31  ;;  %v316_v17 = vld [vmem:[#allocation7 + $0x3f0] sm:$0xff]  ;;  %v1435_v31 = vpack.c.bf16 %v437_v25, %v434_v24  ;;  %v439_v40 = vld [vmem:[#allocation8 + $0xc0] sm:$0xff]  ;;  %v1443_v56 = vpack.c.bf16 %v449_v49, %v446_v48  ;;  %v448_v57 = vld [vmem:[#allocation8 + $0x108] sm:$0xff] }
  0x90   :  { %1348 = vmatprep.subr.bf16.mxu0 %v1347_v22  ;;  %v465_v22 = vld [vmem:[#allocation8 + $0x190] sm:$0xff]  ;;  %v1421_v26 = vpack.c.bf16 %v316_v17, %v314_v16  ;;  %v1441_v51 = vpack.c.bf16 %v442_v45, %v439_v40  ;;  %v483_v58 = vld [vmem:[#allocation8 + $0x220] sm:$0xff]  ;;  %v486_v59 = vld [vmem:[#allocation8 + $0x238] sm:$0xff] }
  0x91   :  { %v1487_v28 = vpack.c.bf16 %v468_v23, %v465_v22  ;;  %v445_v52 = vld [vmem:[#allocation8 + $0xf0] sm:$0xff]  ;;  %v455_v61 = vld [vmem:[#allocation8 + $0x140] sm:$0xff]  ;;  %v1499_v0 = vpack.c.bf16 %v486_v59, %v483_v58  ;;  %v454_v5 = vld [vmem:[#allocation8 + $0x138] sm:$0xff] }
  0x92   :  { %1406 = vmatpush1.bf16.msra.mxu1 %v1405_v41  ;;  %v1445_v62 = vpack.c.bf16 %v448_v57, %v445_v52  ;;  %v451_v63 = vld [vmem:[#allocation8 + $0x120] sm:$0xff]  ;;  %v489_v6 = vld [vmem:[#allocation8 + $0x250] sm:$0xff]  ;;  %v458_v8 = vld [vmem:[#allocation8 + $0x158] sm:$0xff] }
  0x93   :  { %1350 = vmatpush1.bf16.msra.mxu0 %v1349_v29  ;;  %1408 = vmatprep.subr.bf16.mxu1 %v1407_v44  ;;  %v417_v29 = vld [vmem:[#allocation8 + $0x10] sm:$0xff]  ;;  %v1439_v44 = vpack.c.bf16 %v443_v37, %v440_v36  ;;  %v1449_v11 = vpack.c.bf16 %v454_v5, %v451_v63  ;;  %v464_v16 = vld [vmem:[#allocation8 + $0x188] sm:$0xff]  ;;  %v467_v17 = vld [vmem:[#allocation8 + $0x1a0] sm:$0xff] }
  0x94   :  { %1352 = vmatprep.subr.bf16.mxu0 %v1351_v35  ;;  %v474_v35 = vld [vmem:[#allocation8 + $0x1d8] sm:$0xff]  ;;  %v1489_v38 = vpack.c.bf16 %v420_v30, %v417_v29  ;;  %v473_v23 = vld [vmem:[#allocation8 + $0x1d0] sm:$0xff]  ;;  %v476_v27 = vld [vmem:[#allocation8 + $0x1e8] sm:$0xff] }
  0x95   :  { %v1491_v41 = vpack.c.bf16 %v474_v35, %v471_v33  ;;  %v470_v22 = vld [vmem:[#allocation8 + $0x1b8] sm:$0xff]  ;;  %v485_v35 = vld [vmem:[#allocation8 + $0x230] sm:$0xff]  ;;  %v488_v40 = vld [vmem:[#allocation8 + $0x248] sm:$0xff] }
  0x96   :  { %1410 = vmatpush1.bf16.msra.mxu1 %v1409_v53  ;;  %v1459_v25 = vpack.c.bf16 %v473_v23, %v470_v22  ;;  %v478_v32 = vld [vmem:[#allocation8 + $0x1f8] sm:$0xff]  ;;  %v444_v48 = vld [vmem:[#allocation8 + $0xe8] sm:$0xff]  ;;  %v495_v52 = vld [vmem:[#allocation8 + $0x280] sm:$0xff] }
  0x97   :  { %1354 = vmatpush1.bf16.msra.mxu0 %v1353_v42  ;;  %1412 = vmatprep.subr.bf16.mxu1 %v1411_v55  ;;  %v423_v42 = vld [vmem:[#allocation8 + $0x40] sm:$0xff]  ;;  %v432_v55 = vld [vmem:[#allocation8 + $0x88] sm:$0xff]  ;;  %v482_v33 = vld [vmem:[#allocation8 + $0x218] sm:$0xff] }
  0x98   :  { %1356 = vmatprep.subr.bf16.mxu0 %v1355_v47  ;;  %v480_v47 = vld [vmem:[#allocation8 + $0x208] sm:$0xff]  ;;  %v1493_v50 = vpack.c.bf16 %v426_v43, %v423_v42  ;;  %v1467_v37 = vpack.c.bf16 %v485_v35, %v482_v33  ;;  %v490_v45 = vld [vmem:[#allocation8 + $0x258] sm:$0xff]  ;;  %v447_v59 = vld [vmem:[#allocation8 + $0x100] sm:$0xff] }
  0x99   :  { %v1495_v53 = vpack.c.bf16 %v480_v47, %v477_v46  ;;  %v441_v46 = vld [vmem:[#allocation8 + $0xd0] sm:$0xff]  ;;  %v671_v22 = vld [vmem:[#allocation8 + $0x308] sm:$0xff]  ;;  %v674_v23 = vld [vmem:[#allocation8 + $0x320] sm:$0xff] }
  0x9a   :  { %1414 = vmatpush1.bf16.msra.mxu1 %v1413_v1  ;;  %v435_v1 = vld [vmem:[#allocation8 + $0xa0] sm:$0xff]  ;;  %v1505_v49 = vpack.c.bf16 %v444_v48, %v441_v46  ;;  %v501_v63 = vld [vmem:[#allocation8 + $0x2b0] sm:$0xff]  ;;  %v729_v48 = vld [vmem:[#allocation8 + $0x4d8] sm:$0xff] }
  0x9b   :  { %1358 = vmatpush1.bf16.msra.mxu0 %v1357_v54  ;;  %1416 = vmatprep.subr.bf16.mxu1 %v1415_v2  ;;  %v429_v54 = vld [vmem:[#allocation8 + $0x70] sm:$0xff]  ;;  %v438_v2 = vld [vmem:[#allocation8 + $0xb8] sm:$0xff] }
  0x9c   :  { %1424 = vmatprep.subr.bf16.mxu0 %v1423_v60  ;;  %v452_v60 = vld [vmem:[#allocation8 + $0x128] sm:$0xff]  ;;  %v1501_v10 = vpack.c.bf16 %v438_v2, %v435_v1  ;;  %v499_v2 = vld [vmem:[#allocation8 + $0x2a0] sm:$0xff]  ;;  %v680_v46 = vld [vmem:[#allocation8 + $0x350] sm:$0xff] }
  0x9d   :  { %v1447_v4 = vpack.c.bf16 %v455_v61, %v452_v60  ;;  %v450_v60 = vld [vmem:[#allocation8 + $0x118] sm:$0xff]  ;;  %v504_v1 = vld [vmem:[#allocation8 + $0x2c8] sm:$0xff] }
  0x9e   :  { %244 = vmatmul.mubr.f32.vlgmr.msra.gmra.mrb[0].mxu0 %v1963_v34  ;;  %1418 = vmatpush1.bf16.msra.mxu1 %v1417_v14  ;;  %v1433_v34 = vpack.c.bf16 %v430_v21, %v427_v19  ;;  %v457_v14 = vld [vmem:[#allocation8 + $0x150] sm:$0xff]  ;;  %v1455_v19 = vpack.c.bf16 %v467_v17, %v464_v16  ;;  %v466_v21 = vld [vmem:[#allocation8 + $0x198] sm:$0xff]  ;;  %v1509_v61 = vpack.c.bf16 %v450_v60, %v447_v59  ;;  %v508_v17 = vld [vmem:[#allocation8 + $0x2e8] sm:$0xff] }
  0x9f   :  { %1426 = vmatpush1.bf16.msra.mxu0 %v1425_v7  ;;  %1420 = vmatprep.subr.bf16.mxu1 %v1419_v15  ;;  %v492_v7 = vld [vmem:[#allocation8 + $0x268] sm:$0xff]  ;;  %v1511_v5 = vpack.c.bf16 %v504_v1, %v501_v63  ;;  %v505_v16 = vld [vmem:[#allocation8 + $0x2d0] sm:$0xff]  ;;  %v678_v59 = vld [vmem:[#allocation8 + $0x340] sm:$0xff] }
  0xa0   :  { %1428 = vmatprep.subr.bf16.mxu0 %v1427_v9  ;;  %v461_v9 = vld [vmem:[#allocation8 + $0x170] sm:$0xff]  ;;  %v1503_v12 = vpack.c.bf16 %v492_v7, %v489_v6  ;;  %v460_v15 = vld [vmem:[#allocation8 + $0x168] sm:$0xff]  ;;  %v681_v60 = vld [vmem:[#allocation8 + $0x358] sm:$0xff] }
  0xa1   :  { %v1451_v13 = vpack.c.bf16 %v461_v9, %v458_v8  ;;  %v453_v7 = vld [vmem:[#allocation8 + $0x130] sm:$0xff]  ;;  %v456_v8 = vld [vmem:[#allocation8 + $0x148] sm:$0xff]  ;;  %v506_v9 = vld [vmem:[#allocation8 + $0x2d8] sm:$0xff] }
  0xa2   :  { %1422 = vmatpush1.bf16.msra.mxu1 %v1421_v26  ;;  %v469_v26 = vld [vmem:[#allocation8 + $0x1b0] sm:$0xff] }
  0xa3   :  { %1430 = vmatpush1.bf16.msra.mxu0 %v1429_v18  ;;  %1488 = vmatprep.subr.bf16.mxu1 %v1487_v28  ;;  %v1453_v18 = vpack.c.bf16 %v460_v15, %v457_v14  ;;  %v479_v28 = vld [vmem:[#allocation8 + $0x200] sm:$0xff]  ;;  %v732_v63 = vld [vmem:[#allocation8 + $0x4f0] sm:$0xff] }
  0xa4   :  { %1432 = vmatprep.subr.bf16.mxu0 %v1431_v20  ;;  %v463_v20 = vld [vmem:[#allocation8 + $0x180] sm:$0xff]  ;;  %v1463_v30 = vpack.c.bf16 %v479_v28, %v476_v27  ;;  %v158_v27 = vlaneseq }
  0xa5   :  { %407 = vmatmul.mubr.f32.vlgmr.msra.gmra.mrb[0].mxu1 %v1967_v3  ;;  %v1497_v3 = vpack.c.bf16 %v432_v55, %v429_v54  ;;  %v1457_v24 = vpack.c.bf16 %v466_v21, %v463_v20  ;;  %v498_v54 = vld [vmem:[#allocation8 + $0x298] sm:$0xff]  ;;  %v493_v55 = vld [vmem:[#allocation8 + $0x270] sm:$0xff] }
  0xa6   :  { %1490 = vmatpush3.bf16.msra.mxu1 %v1489_v38  ;;  %v481_v38 = vld [vmem:[#allocation8 + $0x210] sm:$0xff]  ;;  %v1507_v57 = vpack.c.bf16 %v498_v54, %v495_v52  ;;  %v462_v20 = vld [vmem:[#allocation8 + $0x178] sm:$0xff]  ;;  %v1973_v28 = vshrl.u32 %v158_v27, 7  ;;  %v679_v54 = vld [vmem:[#allocation8 + $0x348] sm:$0xff] }
  0xa7   :  { %1434 = vmatpush1.bf16.msra.mxu0 %v1433_v34  ;;  %1492 = vmatprep.subr.bf16.mxu1 %v1491_v41  ;;  %v472_v34 = vld [vmem:[#allocation8 + $0x1c8] sm:$0xff]  ;;  %v491_v41 = vld [vmem:[#allocation8 + $0x260] sm:$0xff] }
  0xa8   :  { %1436 = vmatprep.subr.bf16.mxu0 %v1435_v31  ;;  %v1461_v29 = vpack.c.bf16 %v472_v34, %v469_v26  ;;  %v475_v31 = vld [vmem:[#allocation8 + $0x1e0] sm:$0xff]  ;;  %v1471_v43 = vpack.c.bf16 %v491_v41, %v488_v40  ;;  %v723_v26 = vld [vmem:[#allocation8 + $0x4a8] sm:$0xff]  ;;  %v673_v41 = vld [vmem:[#allocation8 + $0x318] sm:$0xff] }
  0xa9   :  { %v1465_v36 = vpack.c.bf16 %v478_v32, %v475_v31  ;;  %v1982_v31 = vsub.s32 1, %v1973_v28  ;;  %v670_v40 = vld [vmem:[#allocation8 + $0x300] sm:$0xff] }
  0xaa   :  { %1494 = vmatpush3.bf16.msra.mxu1 %v1493_v50  ;;  %v494_v50 = vld [vmem:[#allocation8 + $0x278] sm:$0xff] }
  0xab   :  { %1438 = vmatpush1.bf16.msra.mxu0 %v1437_v39  ;;  %1496 = vmatprep.subr.bf16.mxu1 %v1495_v53  ;;  %v484_v39 = vld [vmem:[#allocation8 + $0x228] sm:$0xff] }
  0xac   :  { %1440 = vmatprep.subr.bf16.mxu0 %v1439_v44  ;;  %v1469_v42 = vpack.c.bf16 %v484_v39, %v481_v38  ;;  %v487_v44 = vld [vmem:[#allocation8 + $0x240] sm:$0xff]  ;;  %v1989_v39 = vld [vmem:[%s2024_s3 + $0x2] sm:$0x3] }
  0xad   :  { %v1473_v47 = vpack.c.bf16 %v490_v45, %v487_v44  ;;  %v675_v44 = vld [vmem:[#allocation8 + $0x328] sm:$0xff]  ;;  %v677_v45 = vld [vmem:[#allocation8 + $0x338] sm:$0xff] }
  0xae   :  { %1498 = vmatpush3.bf16.msra.mxu1 %v1497_v3  ;;  %v500_v3 = vld [vmem:[#allocation8 + $0x2a8] sm:$0xff] }
  0xaf   :  { %1442 = vmatpush1.bf16.msra.mxu0 %v1441_v51  ;;  %1500 = vmatprep.subr.bf16.mxu1 %v1499_v0  ;;  %v497_v51 = vld [vmem:[#allocation8 + $0x290] sm:$0xff] }
  0xb0   :  { %1444 = vmatprep.subr.bf16.mxu0 %v1443_v56  ;;  %v1475_v53 = vpack.c.bf16 %v497_v51, %v494_v50  ;;  %v496_v56 = vld [vmem:[#allocation8 + $0x288] sm:$0xff]  ;;  %v1521_v51 = vpack.c.bf16 %v673_v41, %v670_v40  ;;  %v704_v41 = vld [vmem:[#allocation8 + $0x410] sm:$0xff] }
  0xb1   :  { %v1477_v58 = vpack.c.bf16 %v496_v56, %v493_v55 }
  0xb2   :  { %1502 = vmatpush3.bf16.msra.mxu1 %v1501_v10  ;;  %v1513_v10 = vpack.c.bf16 %v456_v8, %v453_v7  ;;  %v684_v8 = vld [vmem:[#allocation8 + $0x370] sm:$0xff] }
  0xb3   :  { %1446 = vmatpush1.bf16.msra.mxu0 %v1445_v62  ;;  %1504 = vmatprep.subr.bf16.mxu1 %v1503_v12  ;;  %v503_v62 = vld [vmem:[#allocation8 + $0x2c0] sm:$0xff] }
  0xb4   :  { %1448 = vmatprep.subr.bf16.mxu0 %v1447_v4  ;;  %v1479_v0 = vpack.c.bf16 %v503_v62, %v500_v3  ;;  %v502_v4 = vld [vmem:[#allocation8 + $0x2b8] sm:$0xff]  ;;  %v507_v12 = vld [vmem:[#allocation8 + $0x2e0] sm:$0xff] }
  0xb5   :  { %v1481_v6 = vpack.c.bf16 %v502_v4, %v499_v2  ;;  %v686_v62 = vld [vmem:[#allocation8 + $0x380] sm:$0xff]  ;;  %v1589_v2 = vpack.c.bf16 %v681_v60, %v678_v59  ;;  %v709_v60 = vld [vmem:[#allocation8 + $0x438] sm:$0xff] }
  0xb6   :  { %1506 = vmatpush3.bf16.msra.mxu1 %v1505_v49  ;;  %v682_v4 = vld [vmem:[#allocation8 + $0x360] sm:$0xff] }
  0xb7   :  { %1450 = vmatpush1.bf16.msra.mxu0 %v1449_v11  ;;  %1508 = vmatprep.subr.bf16.mxu1 %v1507_v57  ;;  %v509_v11 = vld [vmem:[#allocation8 + $0x2f0] sm:$0xff]  ;;  %v1523_v57 = vpack.c.bf16 %v680_v46, %v677_v45  ;;  %v706_v59 = vld [vmem:[#allocation8 + $0x420] sm:$0xff] }
  0xb8   :  { %1452 = vmatprep.subr.bf16.mxu0 %v1451_v13  ;;  %v510_v13 = vld [vmem:[#allocation8 + $0x2f8] sm:$0xff]  ;;  %v1483_v14 = vpack.c.bf16 %v509_v11, %v506_v9  ;;  %v687_v9 = vld [vmem:[#allocation8 + $0x388] sm:$0xff]  ;;  %v692_v11 = vld [vmem:[#allocation8 + $0x3b0] sm:$0xff] }
  0xb9   :  { %v1515_v15 = vpack.c.bf16 %v510_v13, %v507_v12  ;;  %v738_v12 = vld [vmem:[#allocation8 + $0x520] sm:$0xff]  ;;  %v741_v13 = vld [vmem:[#allocation8 + $0x538] sm:$0xff]  ;;  %v700_v46 = vld [vmem:[#allocation8 + $0x3f0] sm:$0xff] }
  0xba   :  { %1510 = vmatpush3.bf16.msra.mxu1 %v1509_v61  ;;  %v683_v61 = vld [vmem:[#allocation8 + $0x368] sm:$0xff] }
  0xbb   :  { %1454 = vmatpush1.bf16.msra.mxu0 %v1453_v18  ;;  %1512 = vmatprep.subr.bf16.mxu1 %v1511_v5  ;;  %v459_v18 = vld [vmem:[#allocation8 + $0x160] sm:$0xff]  ;;  %v685_v5 = vld [vmem:[#allocation8 + $0x378] sm:$0xff] }
  0xbc   :  { %1456 = vmatprep.subr.bf16.mxu0 %v1455_v19  ;;  %v1485_v19 = vpack.c.bf16 %v508_v17, %v505_v16  ;;  %v1517_v21 = vpack.c.bf16 %v462_v20, %v459_v18  ;;  %v688_v16 = vld [vmem:[#allocation8 + $0x390] sm:$0xff]  ;;  %v691_v17 = vld [vmem:[#allocation8 + $0x3a8] sm:$0xff]  ;;  %v690_v20 = vld [vmem:[#allocation8 + $0x3a0] sm:$0xff] }
  0xbe   :  { %1514 = vmatpush3.bf16.msra.mxu1 %v1513_v10  ;;  %v689_v10 = vld [vmem:[#allocation8 + $0x398] sm:$0xff] }
  0xbf   :  { %1458 = vmatpush1.bf16.msra.mxu0 %v1457_v24  ;;  %1516 = vmatprep.subr.bf16.mxu1 %v1515_v15  ;;  %v720_v24 = vld [vmem:[#allocation8 + $0x490] sm:$0xff]  ;;  %v1593_v15 = vpack.c.bf16 %v687_v9, %v684_v8  ;;  %v1531_v18 = vpack.c.bf16 %v692_v11, %v689_v10  ;;  %v715_v9 = vld [vmem:[#allocation8 + $0x468] sm:$0xff]  ;;  %v714_v10 = vld [vmem:[#allocation8 + $0x460] sm:$0xff] }
  0xc0   :  { %1460 = vmatprep.subr.bf16.mxu0 %v1459_v25  ;;  %v1519_v25 = vpack.c.bf16 %v674_v23, %v671_v22  ;;  %v1583_v34 = vpack.c.bf16 %v723_v26, %v720_v24  ;;  %v695_v22 = vld [vmem:[#allocation8 + $0x3c8] sm:$0xff]  ;;  %v698_v23 = vld [vmem:[#allocation8 + $0x3e0] sm:$0xff]  ;;  %v744_v24 = vld [vmem:[#allocation8 + $0x550] sm:$0xff] }
  0xc1   :  { %v717_v11 = vld [vmem:[#allocation8 + $0x478] sm:$0xff] }
  0xc2   :  { %1518 = vmatpush3.bf16.msra.mxu1 %v1517_v21  ;;  %v693_v21 = vld [vmem:[#allocation8 + $0x3b8] sm:$0xff] }
  0xc3   :  { %1462 = vmatpush1.bf16.msra.mxu0 %v1461_v29  ;;  %1520 = vmatprep.subr.bf16.mxu1 %v1519_v25  ;;  %v1976_v29 = vsub.s32 0, %v1973_v28  ;;  %v747_v25 = vld [vmem:[#allocation8 + $0x568] sm:$0xff]  ;;  %v1597_v27 = vpack.c.bf16 %v693_v21, %v690_v20  ;;  %v728_v20 = vld [vmem:[#allocation8 + $0x4d0] sm:$0xff] }
  0xc4   :  { %1464 = vmatprep.subr.bf16.mxu0 %v1463_v30  ;;  %v156_v30 = vld [vmem:[%s2024_s3] sm:$0x3] }
  0xc5   :  { %v161_v32 = vrot.slane %v156_v30, %v1976_v29  ;;  %v165_v33 = vrot.slane %v156_v30, %v1982_v31  ;;  %v694_v30 = vld [vmem:[#allocation8 + $0x3c0] sm:$0xff]  ;;  %v324_v40 = vrot.slane %v1989_v39, %v1976_v29 }
  0xc7   :  { %1466 = vmatpush1.bf16.msra.mxu0 %v1465_v36 }
  0xc8   :  { %1468 = vmatprep.subr.bf16.mxu0 %v1467_v37 }
  0xcb   :  { %1470 = vmatpush1.bf16.msra.mxu0 %v1469_v42  ;;  %v328_v42 = vrot.slane %v1989_v39, %v1982_v31 }
  0xcc   :  { %1472 = vmatprep.subr.bf16.mxu0 %v1471_v43  ;;  %v672_v43 = vld [vmem:[#allocation8 + $0x310] sm:$0xff] }
  0xcd   :  { %v1585_v52 = vpack.c.bf16 %v675_v44, %v672_v43  ;;  %v753_v43 = vld [vmem:[#allocation8 + $0x598] sm:$0xff] }
  0xcf   :  { %1474 = vmatpush1.bf16.msra.mxu0 %v1473_v47  ;;  %v726_v47 = vld [vmem:[#allocation8 + $0x4c0] sm:$0xff] }
  0xd0   :  { %1476 = vmatprep.subr.bf16.mxu0 %v1475_v53  ;;  %v676_v53 = vld [vmem:[#allocation8 + $0x330] sm:$0xff] }
  0xd1   :  { %v1525_v1 = vpack.c.bf16 %v679_v54, %v676_v53  ;;  %v707_v53 = vld [vmem:[#allocation8 + $0x428] sm:$0xff]  ;;  %v710_v54 = vld [vmem:[#allocation8 + $0x440] sm:$0xff] }
  0xd3   :  { %1478 = vmatpush1.bf16.msra.mxu0 %v1477_v58  ;;  %v1587_v58 = vpack.c.bf16 %v729_v48, %v726_v47  ;;  %v703_v47 = vld [vmem:[#allocation8 + $0x408] sm:$0xff] }
  0xd4   :  { %1480 = vmatprep.subr.bf16.mxu0 %v1479_v0  ;;  %v735_v0 = vld [vmem:[#allocation8 + $0x508] sm:$0xff] }
  0xd5   :  { %v1591_v7 = vpack.c.bf16 %v735_v0, %v732_v63  ;;  %v711_v63 = vld [vmem:[#allocation8 + $0x448] sm:$0xff]  ;;  %v713_v0 = vld [vmem:[#allocation8 + $0x458] sm:$0xff] }
  0xd7   :  { %1482 = vmatpush1.bf16.msra.mxu0 %v1481_v6  ;;  %v1527_v6 = vpack.c.bf16 %v686_v62, %v683_v61  ;;  %v1543_v61 = vpack.c.bf16 %v710_v54, %v707_v53  ;;  %v708_v62 = vld [vmem:[#allocation8 + $0x430] sm:$0xff]  ;;  %v755_v54 = vld [vmem:[#allocation8 + $0x5a8] sm:$0xff] }
  0xd8   :  { %1484 = vmatprep.subr.bf16.mxu0 %v1483_v14  ;;  %v1529_v14 = vpack.c.bf16 %v685_v5, %v682_v4  ;;  %v1545_v4 = vpack.c.bf16 %v709_v60, %v706_v59  ;;  %v1609_v5 = vpack.c.bf16 %v711_v63, %v708_v62  ;;  %v748_v53 = vld [vmem:[#allocation8 + $0x570] sm:$0xff]  ;;  %v757_v59 = vld [vmem:[#allocation8 + $0x5b8] sm:$0xff] }
  0xd9   :  { %v761_v60 = vld [vmem:[#allocation8 + $0x5d8] sm:$0xff]  ;;  %v760_v63 = vld [vmem:[#allocation8 + $0x5d0] sm:$0xff] }
  0xdb   :  { %1486 = vmatpush1.bf16.msra.mxu0 %v1485_v19  ;;  %v1595_v19 = vpack.c.bf16 %v741_v13, %v738_v12  ;;  %v719_v12 = vld [vmem:[#allocation8 + $0x488] sm:$0xff]  ;;  %v722_v13 = vld [vmem:[#allocation8 + $0x4a0] sm:$0xff] }
  0xdc   :  { %1584 = vmatprep.subr.bf16.mxu0 %v1583_v34  ;;  %v1533_v34 = vpack.c.bf16 %v691_v17, %v688_v16  ;;  %v1551_v16 = vpack.c.bf16 %v722_v13, %v719_v12  ;;  %v718_v17 = vld [vmem:[#allocation8 + $0x480] sm:$0xff]  ;;  %v966_v12 = vld [vmem:[#allocation10 + $0x130] sm:$0xff]  ;;  %v967_v13 = vld [vmem:[#allocation10 + $0x138] sm:$0xff] }
 0x171   :  { %v245_v35 = vpop.f32.mrb[0].mxu0 }
 0x172   :  { %v246_v36 = vadd.f32 %v245_v35, %v161_v32  ;;  %v247_v37 = vpop.f32.mrb[1].mxu0  ;;  %v697_v32 = vld [vmem:[#allocation8 + $0x3d8] sm:$0xff]  ;;  %v1599_v35 = vpack.c.bf16 %v747_v25, %v744_v24  ;;  %v724_v24 = vld [vmem:[#allocation8 + $0x4b0] sm:$0xff]  ;;  %v727_v25 = vld [vmem:[#allocation8 + $0x4c8] sm:$0xff] }
 0x173   :  { %v248_v38 = vadd.f32 %v247_v37, %v165_v33  ;;  %v1535_v33 = vpack.c.bf16 %v698_v23, %v695_v22  ;;  %v699_v37 = vld [vmem:[#allocation8 + $0x3e8] sm:$0xff]  ;;  %v1537_v44 = vpack.c.bf16 %v697_v32, %v694_v30  ;;  %v730_v32 = vld [vmem:[#allocation8 + $0x4e0] sm:$0xff] }
 0x175   :  { %1686 = vtanh.f32 %v248_v38  ;;  %v701_v38 = vld [vmem:[#allocation8 + $0x3f8] sm:$0xff] }
 0x176   :  { %1688 = vtanh.f32 %v246_v36  ;;  %v696_v36 = vld [vmem:[#allocation8 + $0x3d0] sm:$0xff]  ;;  %v1539_v48 = vpack.c.bf16 %v704_v41, %v701_v38  ;;  %v739_v41 = vld [vmem:[#allocation8 + $0x528] sm:$0xff] }
 0x177   :  { %v1601_v45 = vpack.c.bf16 %v699_v37, %v696_v36  ;;  %v740_v36 = vld [vmem:[#allocation8 + $0x530] sm:$0xff] }
 0x178   :  { %v1993_v49 = vpop.f32.mrb[0].mxu1 }
 0x179   :  { %v410_v50 = vpop.f32.mrb[1].mxu1  ;;  %v409_v39 = vadd.f32 %v1993_v49, %v324_v40  ;;  %v765_v49 = vld [vmem:[#allocation8 + $0x5f8] sm:$0xff]  ;;  %v736_v40 = vld [vmem:[#allocation8 + $0x510] sm:$0xff] }
 0x17a   :  { %v411_v55 = vadd.f32 %v410_v50, %v328_v42  ;;  %v750_v42 = vld [vmem:[#allocation8 + $0x580] sm:$0xff] }
 0x17b   :  { %v1603_v50 = vpack.c.bf16 %v753_v43, %v750_v42  ;;  %v743_v42 = vld [vmem:[#allocation8 + $0x548] sm:$0xff]  ;;  %v746_v43 = vld [vmem:[#allocation8 + $0x560] sm:$0xff] }
 0x17c   :  { %1690 = vtanh.f32 %v411_v55  ;;  %v756_v55 = vld [vmem:[#allocation8 + $0x5b0] sm:$0xff] }
 0x17d   :  { %1692 = vtanh.f32 %v409_v39  ;;  %v751_v39 = vld [vmem:[#allocation8 + $0x588] sm:$0xff] }
 0x17f   :  { %v1687_v56 = vpop.eup %1686 }
 0x180   :  { %v1689_v3 = vpop.eup %1688  ;;  %592 = vmatprep.mubr.f32.mxu0 %v1687_v56  ;;  %663 = vmatprep.mubr.f32.mxu1 %v1687_v56  ;;  %v759_v56 = vld [vmem:[#allocation8 + $0x5c8] sm:$0xff] }
 0x181   :  { %593 = vmatmul.mubr.f32.vlgmr.msra.gmra.mrb[2].mxu0 %v1689_v3  ;;  %664 = vmatmul.mubr.f32.vlgmr.msra.gmra.mrb[2].mxu1 %v1689_v3  ;;  %v1607_v3 = vpack.c.bf16 %v759_v56, %v756_v55  ;;  %v758_v55 = vld [vmem:[#allocation8 + $0x5c0] sm:$0xff]  ;;  %v1573_v56 = vpack.c.bf16 %v751_v39, %v748_v53  ;;  %v934_v39 = vld [vmem:[#allocation10 + $0x30] sm:$0xff] }
 0x182   :  { %1522 = vmatpush1.bf16.msra.mxu1 %v1521_v51  ;;  %1586 = vmatpush3.bf16.msra.mxu0 %v1585_v52  ;;  %v702_v51 = vld [vmem:[#allocation8 + $0x400] sm:$0xff]  ;;  %v705_v52 = vld [vmem:[#allocation8 + $0x418] sm:$0xff] }
 0x183   :  { %1524 = vmatprep.subr.bf16.mxu1 %v1523_v57  ;;  %1588 = vmatprep.subr.bf16.mxu0 %v1587_v58  ;;  %v1541_v57 = vpack.c.bf16 %v703_v47, %v700_v46  ;;  %v1605_v58 = vpack.c.bf16 %v705_v52, %v702_v51  ;;  %v742_v46 = vld [vmem:[#allocation8 + $0x540] sm:$0xff]  ;;  %v745_v47 = vld [vmem:[#allocation8 + $0x558] sm:$0xff] }
 0x184   :  { %v1569_v51 = vpack.c.bf16 %v745_v47, %v742_v46  ;;  %v932_v47 = vld [vmem:[#allocation10 + $0x20] sm:$0xff] }
 0x186   :  { %1526 = vmatpush1.bf16.msra.mxu1 %v1525_v1  ;;  %1590 = vmatpush3.bf16.msra.mxu0 %v1589_v2  ;;  %v1691_v26 = vpop.eup %1690  ;;  %v716_v1 = vld [vmem:[#allocation8 + $0x470] sm:$0xff]  ;;  %v762_v2 = vld [vmem:[#allocation8 + $0x5e0] sm:$0xff] }
 0x187   :  { %1528 = vmatprep.subr.bf16.mxu1 %v1527_v6  ;;  %1592 = vmatprep.subr.bf16.mxu0 %v1591_v7  ;;  %v712_v6 = vld [vmem:[#allocation8 + $0x450] sm:$0xff]  ;;  %v1547_v7 = vpack.c.bf16 %v716_v1, %v713_v0  ;;  %v1611_v8 = vpack.c.bf16 %v765_v49, %v762_v2  ;;  %v1693_v21 = vpop.eup %1692  ;;  %v763_v0 = vld [vmem:[#allocation8 + $0x5e8] sm:$0xff]  ;;  %v960_v2 = vld [vmem:[#allocation10 + $0x100] sm:$0xff] }
 0x188   :  { %919 = vmatprep.mubr.f32.mxu0 %v1691_v26  ;;  %848 = vmatprep.mubr.f32.mxu1 %v1691_v26  ;;  %v731_v26 = vld [vmem:[#allocation8 + $0x4e8] sm:$0xff]  ;;  %v1581_v1 = vpack.c.bf16 %v763_v0, %v760_v63  ;;  %v938_v0 = vld [vmem:[#allocation10 + $0x50] sm:$0xff] }
 0x189   :  { %v961_v49 = vld [vmem:[#allocation10 + $0x108] sm:$0xff] }
 0x18a   :  { %1530 = vmatpush1.bf16.msra.mxu1 %v1529_v14  ;;  %1594 = vmatpush3.bf16.msra.mxu0 %v1593_v15  ;;  %v1549_v14 = vpack.c.bf16 %v715_v9, %v712_v6  ;;  %v1613_v15 = vpack.c.bf16 %v717_v11, %v714_v10  ;;  %v1648_v6 = vpack.c.bf16 %v961_v49, %v960_v2  ;;  %v964_v9 = vld [vmem:[#allocation10 + $0x120] sm:$0xff]  ;;  %v965_v10 = vld [vmem:[#allocation10 + $0x128] sm:$0xff] }
 0x18b   :  { %1532 = vmatprep.subr.bf16.mxu1 %v1531_v18  ;;  %1596 = vmatprep.subr.bf16.mxu0 %v1595_v19  ;;  %v721_v18 = vld [vmem:[#allocation8 + $0x498] sm:$0xff]  ;;  %v1654_v11 = vpack.c.bf16 %v965_v10, %v964_v9  ;;  %v956_v2 = vld [vmem:[#allocation10 + $0xe0] sm:$0xff]  ;;  %v957_v49 = vld [vmem:[#allocation10 + $0xe8] sm:$0xff] }
 0x18c   :  { %v725_v19 = vld [vmem:[#allocation8 + $0x4b8] sm:$0xff]  ;;  %v1553_v22 = vpack.c.bf16 %v721_v18, %v718_v17  ;;  %v970_v18 = vld [vmem:[#allocation10 + $0x150] sm:$0xff] }
 0x18d   :  { %v1555_v23 = vpack.c.bf16 %v728_v20, %v725_v19  ;;  %v971_v19 = vld [vmem:[#allocation10 + $0x158] sm:$0xff]  ;;  %v958_v9 = vld [vmem:[#allocation10 + $0xf0] sm:$0xff] }
 0x18e   :  { %1534 = vmatpush1.bf16.msra.mxu1 %v1533_v34  ;;  %1598 = vmatpush3.bf16.msra.mxu0 %v1597_v27  ;;  %v734_v34 = vld [vmem:[#allocation8 + $0x500] sm:$0xff]  ;;  %v1557_v27 = vpack.c.bf16 %v727_v25, %v724_v24  ;;  %v1663_v20 = vpack.c.bf16 %v971_v19, %v970_v18  ;;  %v974_v24 = vld [vmem:[#allocation10 + $0x170] sm:$0xff]  ;;  %v975_v25 = vld [vmem:[#allocation10 + $0x178] sm:$0xff] }
 0x18f   :  { %1536 = vmatprep.subr.bf16.mxu1 %v1535_v33  ;;  %1600 = vmatprep.subr.bf16.mxu0 %v1599_v35  ;;  %v1559_v30 = vpack.c.bf16 %v734_v34, %v731_v26  ;;  %v733_v33 = vld [vmem:[#allocation8 + $0x4f8] sm:$0xff]  ;;  %v1669_v26 = vpack.c.bf16 %v975_v25, %v974_v24  ;;  %v944_v34 = vld [vmem:[#allocation10 + $0x80] sm:$0xff] }
 0x190   :  { %v737_v35 = vld [vmem:[#allocation8 + $0x518] sm:$0xff]  ;;  %v1561_v37 = vpack.c.bf16 %v733_v33, %v730_v32  ;;  %v928_v32 = vld [vmem:[#allocation10] sm:$0xff]  ;;  %v929_v33 = vld [vmem:[#allocation10 + $0x8] sm:$0xff] }
 0x191   :  { %v1563_v38 = vpack.c.bf16 %v740_v36, %v737_v35  ;;  %v1617_v35 = vpack.c.bf16 %v929_v33, %v928_v32  ;;  %v1847_v36 = vmov 0.0   ;;  %v959_v10 = vld [vmem:[#allocation10 + $0xf8] sm:$0xff] }
 0x192   :  { %1538 = vmatpush1.bf16.msra.mxu1 %v1537_v44  ;;  %1602 = vmatpush3.bf16.msra.mxu0 %v1601_v45  ;;  %v1565_v44 = vpack.c.bf16 %v739_v41, %v736_v40  ;;  %v1567_v45 = vpack.c.bf16 %v746_v43, %v743_v42  ;;  %v930_v40 = vld [vmem:[#allocation10 + $0x10] sm:$0xff]  ;;  %v931_v42 = vld [vmem:[#allocation10 + $0x18] sm:$0xff]  ;;  %v948_v43 = vld [vmem:[#allocation10 + $0xa0] sm:$0xff] }
 0x193   :  { %1540 = vmatprep.subr.bf16.mxu1 %v1539_v48  ;;  %1604 = vmatprep.subr.bf16.mxu0 %v1603_v50  ;;  %v749_v48 = vld [vmem:[#allocation8 + $0x578] sm:$0xff]  ;;  %v752_v50 = vld [vmem:[#allocation8 + $0x590] sm:$0xff] }
 0x194   :  { %v1571_v52 = vpack.c.bf16 %v752_v50, %v749_v48  ;;  %v933_v48 = vld [vmem:[#allocation10 + $0x28] sm:$0xff]  ;;  %v950_v50 = vld [vmem:[#allocation10 + $0xb0] sm:$0xff] }
 0x196   :  { %1542 = vmatpush1.bf16.msra.mxu1 %v1541_v57  ;;  %1606 = vmatpush3.bf16.msra.mxu0 %v1605_v58  ;;  %v1575_v57 = vpack.c.bf16 %v758_v55, %v755_v54  ;;  %v754_v58 = vld [vmem:[#allocation8 + $0x5a0] sm:$0xff]  ;;  %v935_v54 = vld [vmem:[#allocation10 + $0x38] sm:$0xff] }
 0x197   :  { %1544 = vmatprep.subr.bf16.mxu1 %v1543_v61  ;;  %1608 = vmatprep.subr.bf16.mxu0 %v1607_v3  ;;  %v764_v61 = vld [vmem:[#allocation8 + $0x5f0] sm:$0xff]  ;;  %v1577_v3 = vpack.c.bf16 %v757_v59, %v754_v58  ;;  %v952_v55 = vld [vmem:[#allocation10 + $0xc0] sm:$0xff] }
 0x198   :  { %v1579_v62 = vpack.c.bf16 %v764_v61, %v761_v60  ;;  %v936_v59 = vld [vmem:[#allocation10 + $0x40] sm:$0xff]  ;;  %v937_v60 = vld [vmem:[#allocation10 + $0x48] sm:$0xff]  ;;  %v954_v61 = vld [vmem:[#allocation10 + $0xd0] sm:$0xff] }
 0x19a   :  { %1546 = vmatpush1.bf16.msra.mxu1 %v1545_v4  ;;  %1610 = vmatpush3.bf16.msra.mxu0 %v1609_v5  ;;  %v962_v4 = vld [vmem:[#allocation10 + $0x110] sm:$0xff]  ;;  %v1845_v5 = vmov 0.0|0.0  }
 0x19b   :  { %1548 = vmatprep.subr.bf16.mxu1 %v1547_v7  ;;  %1612 = vmatprep.subr.bf16.mxu0 %v1611_v8  ;;  %v963_v7 = vld [vmem:[#allocation10 + $0x118] sm:$0xff] }
 0x19c   :  { %v1651_v8 = vpack.c.bf16 %v963_v7, %v962_v4  ;;  %v941_v7 = vld [vmem:[#allocation10 + $0x68] sm:$0xff] }
 0x19e   :  { %1550 = vmatpush1.bf16.msra.mxu1 %v1549_v14  ;;  %1614 = vmatpush3.bf16.msra.mxu0 %v1613_v15  ;;  %v1657_v14 = vpack.c.bf16 %v967_v13, %v966_v12  ;;  %v968_v15 = vld [vmem:[#allocation10 + $0x140] sm:$0xff]  ;;  %v942_v12 = vld [vmem:[#allocation10 + $0x70] sm:$0xff]  ;;  %v943_v13 = vld [vmem:[#allocation10 + $0x78] sm:$0xff] }
 0x19f   :  { %1552 = vmatprep.subr.bf16.mxu1 %v1551_v16  ;;  %v969_v16 = vld [vmem:[#allocation10 + $0x148] sm:$0xff] }
 0x1a0   :  { %v1660_v17 = vpack.c.bf16 %v969_v16, %v968_v15 }
 0x1a1   :  { %920 = vmatmul.mubr.f32.vlgmr.msra.gmra.mrb[4].mxu0 %v1693_v21 }
 0x1a2   :  { %1554 = vmatpush1.bf16.msra.mxu1 %v1553_v22  ;;  %v973_v22 = vld [vmem:[#allocation10 + $0x168] sm:$0xff] }
 0x1a3   :  { %1556 = vmatprep.subr.bf16.mxu1 %v1555_v23 }
 0x1a6   :  { %1558 = vmatpush1.bf16.msra.mxu1 %v1557_v27  ;;  %v945_v27 = vld [vmem:[#allocation10 + $0x88] sm:$0xff] }
 0x1a7   :  { %1560 = vmatprep.subr.bf16.mxu1 %v1559_v30  ;;  %v1615_v30 = vpack.c.bf16 %v945_v27, %v944_v34 }
 0x1a9   :  { %1616 = vmatprep.subr.bf16.mxu0 %v1615_v30 }
 0x1aa   :  { %1562 = vmatpush1.bf16.msra.mxu1 %v1561_v37  ;;  %1618 = vmatpush3.bf16.msra.mxu0 %v1617_v35  ;;  %v946_v37 = vld [vmem:[#allocation10 + $0x90] sm:$0xff] }
 0x1ab   :  { %1564 = vmatprep.subr.bf16.mxu1 %v1563_v38  ;;  %v947_v38 = vld [vmem:[#allocation10 + $0x98] sm:$0xff] }
 0x1ac   :  { %v1619_v41 = vpack.c.bf16 %v947_v38, %v946_v37 }
 0x1ae   :  { %1566 = vmatpush1.bf16.msra.mxu1 %v1565_v44  ;;  %v949_v44 = vld [vmem:[#allocation10 + $0xa8] sm:$0xff]  ;;  %1620 = vmatprep.subr.bf16.mxu0 %v1619_v41 }
 0x1af   :  { %1568 = vmatprep.subr.bf16.mxu1 %v1567_v45  ;;  %v1621_v45 = vpack.c.bf16 %v931_v42, %v930_v40  ;;  %v1623_v46 = vpack.c.bf16 %v949_v44, %v948_v43 }
 0x1b1   :  { %1622 = vmatpush3.bf16.msra.mxu0 %v1621_v45 }
 0x1b2   :  { %1570 = vmatpush1.bf16.msra.mxu1 %v1569_v51  ;;  %v951_v51 = vld [vmem:[#allocation10 + $0xb8] sm:$0xff]  ;;  %1624 = vmatprep.subr.bf16.mxu0 %v1623_v46 }
 0x1b3   :  { %1572 = vmatprep.subr.bf16.mxu1 %v1571_v52  ;;  %v1625_v52 = vpack.c.bf16 %v933_v48, %v932_v47  ;;  %v1627_v53 = vpack.c.bf16 %v951_v51, %v950_v50 }
 0x1b5   :  { %1626 = vmatpush3.bf16.msra.mxu0 %v1625_v52 }
 0x1b6   :  { %1574 = vmatpush1.bf16.msra.mxu1 %v1573_v56  ;;  %v953_v56 = vld [vmem:[#allocation10 + $0xc8] sm:$0xff]  ;;  %1628 = vmatprep.subr.bf16.mxu0 %v1627_v53 }
 0x1b7   :  { %1576 = vmatprep.subr.bf16.mxu1 %v1575_v57  ;;  %v1629_v57 = vpack.c.bf16 %v935_v54, %v934_v39  ;;  %v1631_v58 = vpack.c.bf16 %v953_v56, %v952_v55 }
 0x1b9   :  { %1630 = vmatpush3.bf16.msra.mxu0 %v1629_v57 }
 0x1ba   :  { %1578 = vmatpush1.bf16.msra.mxu1 %v1577_v3  ;;  %v955_v3 = vld [vmem:[#allocation10 + $0xd8] sm:$0xff]  ;;  %1632 = vmatprep.subr.bf16.mxu0 %v1631_v58 }
 0x1bb   :  { %1580 = vmatprep.subr.bf16.mxu1 %v1579_v62  ;;  %v1633_v62 = vpack.c.bf16 %v937_v60, %v936_v59  ;;  %v1635_v63 = vpack.c.bf16 %v955_v3, %v954_v61 }
 0x1bd   :  { %1634 = vmatpush3.bf16.msra.mxu0 %v1633_v62 }
 0x1be   :  { %1582 = vmatpush1.bf16.msra.mxu1 %v1581_v1  ;;  %v939_v1 = vld [vmem:[#allocation10 + $0x58] sm:$0xff]  ;;  %1636 = vmatprep.subr.bf16.mxu0 %v1635_v63 }
 0x1bf   :  { %1647 = vmatprep.subr.bf16.mxu1 %v1845_v5  ;;  %v1637_v4 = vpack.c.bf16 %v939_v1, %v938_v0 }
 0x1c1   :  { %849 = vmatmul.mubr.f32.vlgmr.msra.gmra.mrb[4].mxu1 %v1693_v21  ;;  %v972_v21 = vld [vmem:[#allocation10 + $0x160] sm:$0xff]  ;;  %1638 = vmatpush3.bf16.msra.mxu0 %v1637_v4 }
 0x1c2   :  { %1649 = vmatpush3.bf16.msra.mxu1 %v1648_v6  ;;  %v1666_v23 = vpack.c.bf16 %v973_v22, %v972_v21  ;;  %1292 = vmatprep.mubr.msk.f32.mxu1 %vm1846_vm0, %v1847_v36  ;;  %v940_v6 = vld [vmem:[#allocation10 + $0x60] sm:$0xff]  ;;  %v1137_v21 = vld [vmem:[%s2026_s5 + $0x3] sm:$0x7]  ;;  %v511_v22 = vld [vmem:[%s2026_s5] sm:$0x7]  ;;  %s1848_s5 = smov [#allocation11]  }
 0x1c3   :  { %1650 = vmatprep.subr.bf16.mxu1 %v1845_v5  ;;  %v516_v33 = vrot.slane %v511_v22, %v1976_v29  ;;  %v520_v35 = vrot.slane %v511_v22, %v1982_v31  ;;  %v776_v36 = vrot.slane %v1137_v21, %v1982_v31  ;;  %s1123_s21 = sshll.u32 %s1848_s5, 4  ;;  %s1124_s21 = int_to_ptr.vmem [resolvable:$true] %s1123_s21 }
 0x1c4   :  { %s1804_s22 = scalar_lea.vmem %s1124_s21, 32  ;;  %p1809_p13 = scmp.lt.s32.totalorder %s1124_s21, %s1124_s21 }
 0x1c5   :  { %p1805_p12 = scmp.ne.s32.totalorder %s1124_s21, %s1804_s22  ;;  %p1810_p0 = scmp.lt.s32.totalorder %s1804_s22, %s1804_s22 }
 0x1c6   :  { %1652 = vmatpush3.bf16.msra.mxu1 %v1651_v8  ;;  %v1641_v8 = vpack.c.bf16 %v941_v7, %v940_v6 }
 0x1c7   :  { %1653 = vmatprep.subr.bf16.mxu1 %v1845_v5  ;;  %p1811_p1 = por %p1810_p0, %p1809_p13 }
 0x1c9   :  { %p1812_p2 = pnand %p1811_p1, %p1805_p12 }
 0x1ca   :  { %1655 = vmatpush3.bf16.msra.mxu1 %v1654_v11  ;;  %v1643_v11 = vpack.c.bf16 %v959_v10, %v958_v9 }
 0x1cb   :  { %1656 = vmatprep.subr.bf16.mxu1 %v1845_v5 }
 0x1ce   :  { %1658 = vmatpush3.bf16.msra.mxu1 %v1657_v14  ;;  %v1645_v14 = vpack.c.bf16 %v943_v13, %v942_v12 }
 0x1cf   :  { %1659 = vmatprep.subr.bf16.mxu1 %v1845_v5 }
 0x1d2   :  { %1661 = vmatpush3.bf16.msra.mxu1 %v1660_v17 }
 0x1d3   :  { %1662 = vmatprep.subr.bf16.mxu1 %v1845_v5 }
 0x1d6   :  { %1664 = vmatpush3.bf16.msra.mxu1 %v1663_v20  ;;  %v523_v20 = vsub.s32 2, %v1973_v28  ;;  %v772_v28 = vrot.slane %v1137_v21, %v1976_v29 }
 0x1d7   :  { %1665 = vmatprep.subr.bf16.mxu1 %v1845_v5 }
 0x1d8   :  { %v780_v25 = vrot.slane %v1137_v21, %v523_v20 }
 0x1da   :  { %1667 = vmatpush3.bf16.msra.mxu1 %v1666_v23  ;;  %v524_v23 = vrot.slane %v511_v22, %v523_v20 }
 0x1db   :  { %1668 = vmatprep.subr.bf16.mxu1 %v1845_v5  ;;  %v1639_v5 = vpack.c.bf16 %v957_v49, %v956_v2 }
 0x1dd   :  { %1640 = vmatprep.subr.bf16.mxu0 %v1639_v5 }
 0x1de   :  { %1670 = vmatpush3.bf16.msra.mxu1 %v1669_v26  ;;  %1642 = vmatpush3.bf16.msra.mxu0 %v1641_v8 }
 0x1df   :  { %1644 = vmatprep.subr.bf16.mxu0 %v1643_v11 }
 0x1e2   :  { %1646 = vmatpush3.bf16.msra.mxu0 %v1645_v14 }
 0x254   :  { %v594_v15 = vpop.f32.mrb[2].mxu0  ;;  %v1170_v16 = vpop.f32.mrb[2].mxu1 }
 0x255   :  { %v596_v17 = vpop.f32.mrb[3].mxu0  ;;  %v1171_v18 = vpop.f32.mrb[3].mxu1  ;;  %v595_v38 = vadd.f32 %v594_v15, %v516_v33 }
 0x256   :  { %v1172_v19 = vadd.f32 %v1171_v18, %v1170_v16  ;;  %v597_v42 = vadd.f32 %v596_v17, %v520_v35 }
 0x258   :  { %v666_v27 = vadd.f32 %v1172_v19, %v524_v23 }
 0x274   :  { %v1205_v24 = vpop.f32.mrb[4].mxu0 }
 0x275   :  { %v1206_v26 = vpop.f32.mrb[5].mxu0 }
 0x276   :  { %v1207_v34 = vadd.f32 %v1206_v26, %v1205_v24 }
 0x278   :  { %v922_v30 = vadd.f32 %v1207_v34, %v780_v25 }
 0x27a   :  { %v927_v32 = vmul.f32 %v922_v30, %v666_v27 }
 0x27c   :  { %1293 = vmatmul.mubr.f32.vlgmr.msra.gmra.mrb[6].mxu1 %v927_v32 }
 0x294   :  { %v850_v37 = vpop.f32.mrb[4].mxu1 }
 0x295   :  { %v851_v40 = vadd.f32 %v850_v37, %v772_v28  ;;  %v852_v41 = vpop.f32.mrb[5].mxu1 }
 0x296   :  { %v853_v43 = vadd.f32 %v852_v41, %v776_v36 }
 0x297   :  { %v925_v44 = vmul.f32 %v851_v40, %v595_v38 }
 0x298   :  { %v926_v45 = vmul.f32 %v853_v43, %v597_v42 }
 0x29a   :  { %1040 = vmatprep.mubr.f32.mxu0 %v926_v45 }
 0x29b   :  { %1041 = vmatmul.mubr.f32.vlgmr.msra.gmra.mrb[6].mxu0 %v925_v44 }
 0x34f   :  { %v1112_v46 = vpop.f32.mrb[6].mxu1 }
 0x350   :  { %v1294_v47 = vpop.f32.mrb[7].mxu1 }
 0x36e   :  { %v1240_v48 = vpop.f32.mrb[6].mxu0 }
 0x36f   :  { %v1241_v50 = vpop.f32.mrb[7].mxu0 }
 0x370   :  { %v1242_v29 = vadd.f32 %v1241_v50, %v1240_v48 }
 0x372   :  { %v1113_v51 = vadd.f32 %v1242_v29, %v1112_v46 }
 0x374   :  { %1116 = vst [vmem:[#allocation11] sm:$0x3] %v1113_v51 }
 0x375   :  { %1815 = shalt.err (!%p1812_p2)
}
 0x376   :  { %s1816_s23 = scalar_lea.hbm %s2028_s7, 32 }
 0x377   :  { %p1817_p3 = scmp.ne.s32.totalorder %s2028_s7, %s1816_s23  ;;  %p1820_p4 = scmp.lt.u32.totalorder %s1816_s23, %s2028_s7 }
 0x379   :  { %p1822_p5 = pnand %p1820_p4, %p1817_p3 }
 0x37b   :  { %1825 = shalt.err (!%p1822_p5)
}
 0x37c   :  { %1126 = dma.vmem_to_hbm [thread:$0]  %s1124_s21, 32, %s2028_s7, [#allocation4]  }
 0x37d   :  { %1832 = dma.done.wait [#allocation4], 32  }
 0x37e   :  { %1833 = vsyncadd [#allocation4], 4294967264 }
 0x37f   :  { %1130 = vsyncpa [#allocation3], 1 }
 0x380   :  { %1131 = vsyncpa [#allocation6], 1 }
 0x381   :  { %1132 = vsyncpa [#allocation9], 1 }
 0x382   :  { %1133 = vsyncpa [#allocation4], 1 }

</bundles_post_ra>
